<compile_context>
chip_gen: v6e
topology: v6e:2x2x1
jax: 0.10.0
libtpu: 0.0.40
codegen_flags: <defaults>
</compile_context>

<pallas_src>
import jax
import jax.numpy as jnp
from jax import lax
from jax.experimental import pallas as pl
from jax.experimental.pallas import tpu as pltpu


def encoder_gru_kernel(gi_ref, whh_ref, bhh_ref, out_ref, hid_ref, h_scr):
    """Fused bidirectional GRU recurrence (single invocation, all VMEM resident).

    gi_ref : (T, Bp, 6H) bf16  precomputed x @ W_ih + b_ih, gate-interleaved
             columns [r_f r_b z_f z_b n_f n_b]; fwd slots hold position t, bwd
             slots hold position T-1-t, so each step reads exactly one row.
    whh_ref: (2H, 6H) bf16     block-diagonal recurrent weights, same column order.
    bhh_ref: (1, 6H)  f32      recurrent bias, same column order.
    out_ref: (T, Bp, H) f32    fwd_out + bwd_out (== outputs[...,:H] + outputs[...,H:]).
    hid_ref: (2, Bp, H) f32    final hidden [h_fwd_T, h_bwd_0].
    h_scr  : (T, Bp, 2H) f32   VMEM scratch: full per-step hidden rows.
    """
    T, Bp, H = out_ref.shape
    H2 = 2 * H

    whh = whh_ref[...]        # (2H, 6H) bf16, loaded once (loop-invariant MXU RHS)
    bhh = bhh_ref[...]        # (1, 6H)  f32

    def step(t, h_cat):
        # h_cat: (Bp, 2H) f32, lanes [0:H] = fwd state, [H:2H] = bwd state
        gi = gi_ref[t].astype(jnp.float32)                      # (Bp, 6H)
        gh = jnp.dot(h_cat.astype(jnp.bfloat16), whh,
                     preferred_element_type=jnp.float32) + bhh  # (Bp, 6H)
        # r/z fused: columns [r_f r_b z_f z_b] == lanes 0..127 -> one EUP push.
        rz = jax.nn.sigmoid(gi[:, :2 * H2] + gh[:, :2 * H2])
        r = rz[:, :H2]
        z = rz[:, H2:]
        n = jnp.tanh(gi[:, 2 * H2:] + r * gh[:, 2 * H2:])
        h_new = (1.0 - z) * n + z * h_cat                       # (Bp, 2H)
        h_scr[t] = h_new            # single full-width store on the serial chain
        return h_new

    unroll = True if T <= 16 else 4
    h_final = lax.fori_loop(0, T, step, jnp.zeros((Bp, H2), jnp.float32),
                            unroll=unroll)

    # Off-chain epilogue: split fwd/bwd halves, time-reverse the bwd half and
    # sum.  bwd lane-slot of h_scr row s holds source position T-1-s, so the bwd
    # output for position t lives in h_scr[T-1-t, :, H:].  T is static & small,
    # so a static Python loop avoids any reliance on lax.rev lowering.
    scr = h_scr[...]
    for t in range(T):
        out_ref[t] = scr[t, :, :H] + scr[T - 1 - t, :, H:]

    hid_ref[0] = h_final[:, :H]
    hid_ref[1] = h_final[:, H:]


def _gate_interleave(f_mat, b_mat, H):
    """Columns [r|z|n] per direction -> [r_f r_b z_f z_b n_f n_b]."""
    blocks = []
    for g in range(3):
        blocks.append(f_mat[:, g * H:(g + 1) * H])
        blocks.append(b_mat[:, g * H:(g + 1) * H])
    return jnp.concatenate(blocks, axis=1)


def _block_diag_gate_interleave(whh_f, whh_b, H):
    """(H,3H) fwd/bwd recurrent weights -> (2H,6H) block-diag, gate-interleaved."""
    z = jnp.zeros((H, H), whh_f.dtype)
    blocks = []
    for g in range(3):
        blocks.append(jnp.concatenate([whh_f[:, g * H:(g + 1) * H], z], axis=0))
        blocks.append(jnp.concatenate([z, whh_b[:, g * H:(g + 1) * H]], axis=0))
    return jnp.concatenate(blocks, axis=1)


def encoder_forward(src, params):
    T, B = src.shape
    V = params["embed"].shape[0]
    H = params["whh_f"].shape[0]
    H2, G6 = 2 * H, 6 * H
    Bp = ((B + 7) // 8) * 8                  # pad batch to the 8-sublane granule

    # --- Weight packing: fuse both directions, gate-interleaved columns ---
    wih_cat = _gate_interleave(params["wih_f"], params["wih_b"], H)    # (E, 6H)
    bih_cat = _gate_interleave(params["bih_f"], params["bih_b"], H)    # (1, 6H)
    bhh_cat = _gate_interleave(params["bhh_f"], params["bhh_b"], H)    # (1, 6H)
    whh_bd = _block_diag_gate_interleave(
        params["whh_f"], params["whh_b"], H).astype(jnp.bfloat16)      # (2H, 6H)

    # --- Embedding + input projection (both time-parallel, kept in XLA) ---
    src_p = jnp.pad(src, ((0, 0), (0, Bp - B)))                        # pad with token 0
    if V <= 4 * T * Bp:
        # Small vocab: fuse projection into the lookup table (one gather/token).
        proj = params["embed"].astype(jnp.float32) @ wih_cat + bih_cat  # (V, 6H)
        gi_all = jnp.take(proj, src_p, axis=0)                          # (T, Bp, 6H)
    else:
        # Realistic vocab: gather narrow embeddings, then one batched matmul,
        # instead of pre-projecting a 6H-wide table (12x gather traffic).
        emb = jnp.take(params["embed"].astype(jnp.float32), src_p, axis=0)  # (T,Bp,E)
        gi_all = jnp.einsum("tbe,eg->tbg", emb, wih_cat) + bih_cat          # (T,Bp,6H)

    # fwd lane-slots keep position t; bwd lane-slots take position T-1-t so the
    # kernel reads a single row per recurrence step.
    lane_is_fwd = jnp.tile(
        jnp.concatenate([jnp.ones((H,), dtype=jnp.bool_),
                         jnp.zeros((H,), dtype=jnp.bool_)]), 3)
    gi_kernel = jnp.where(lane_is_fwd, gi_all, gi_all[::-1]).astype(jnp.bfloat16)

    grid_spec = pltpu.PrefetchScalarGridSpec(
        num_scalar_prefetch=0,
        grid=(1,),                           # single invocation; all data in VMEM
        in_specs=[
            pl.BlockSpec((T, Bp, G6), lambda i: (0, 0, 0)),
            pl.BlockSpec((H2, G6), lambda i: (0, 0)),
            pl.BlockSpec((1, G6), lambda i: (0, 0)),
        ],
        out_specs=[
            pl.BlockSpec((T, Bp, H), lambda i: (0, 0, 0)),
            pl.BlockSpec((2, Bp, H), lambda i: (0, 0, 0)),
        ],
        scratch_shapes=[pltpu.VMEM((T, Bp, H2), jnp.float32)],
    )

    out_p, hid_p = pl.pallas_call(
        encoder_gru_kernel,
        grid_spec=grid_spec,
        out_shape=(
            jax.ShapeDtypeStruct((T, Bp, H), jnp.float32),
            jax.ShapeDtypeStruct((2, Bp, H), jnp.float32),
        ),
        compiler_params=pltpu.CompilerParams(
            dimension_semantics=("arbitrary",)),
    )(gi_kernel, whh_bd, bhh_cat)

    return out_p[:, :B, :], hid_p[:, :B, :]


def init_params(key, vocab, E, H):
    ks = jax.random.split(key, 9)
    s = 0.1
    return {
        "embed": jax.random.normal(ks[0], (vocab, E), jnp.float32) * s,
        # stored as transposed PyTorch weights: W_ih^T (E, 3H), W_hh^T (H, 3H)
        "wih_f": jax.random.normal(ks[1], (E, 3 * H), jnp.float32) * s,
        "whh_f": jax.random.normal(ks[2], (H, 3 * H), jnp.float32) * s,
        "bih_f": jax.random.normal(ks[3], (1, 3 * H), jnp.float32) * s,
        "bhh_f": jax.random.normal(ks[4], (1, 3 * H), jnp.float32) * s,
        "wih_b": jax.random.normal(ks[5], (E, 3 * H), jnp.float32) * s,
        "whh_b": jax.random.normal(ks[6], (H, 3 * H), jnp.float32) * s,
        "bih_b": jax.random.normal(ks[7], (1, 3 * H), jnp.float32) * s,
        "bhh_b": jax.random.normal(ks[8], (1, 3 * H), jnp.float32) * s,
    }


def reference_forward(src, params):
    """Pure-JAX f32 reference (lax.scan) for correctness checking."""
    H = params["whh_f"].shape[0]
    x = jnp.take(params["embed"], src, axis=0).astype(jnp.float32)
    B = src.shape[1]

    def cell(h, xt, wih, whh, bih, bhh):
        gi = xt @ wih + bih
        gh = h @ whh + bhh
        r = jax.nn.sigmoid(gi[:, :H] + gh[:, :H])
        z = jax.nn.sigmoid(gi[:, H:2 * H] + gh[:, H:2 * H])
        n = jnp.tanh(gi[:, 2 * H:] + r * gh[:, 2 * H:])
        return (1.0 - z) * n + z * h

    h0 = jnp.zeros((B, H), jnp.float32)

    def scan_dir(x_seq, wih, whh, bih, bhh):
        def body(h, xt):
            hn = cell(h, xt, wih, whh, bih, bhh)
            return hn, hn
        return lax.scan(body, h0, x_seq)

    hF, outF = scan_dir(x, params["wih_f"], params["whh_f"],
                        params["bih_f"], params["bhh_f"])
    hB, outB_rev = scan_dir(x[::-1], params["wih_b"], params["whh_b"],
                            params["bih_b"], params["bhh_b"])
    return outF + outB_rev[::-1], jnp.stack([hF, hB], axis=0)


if __name__ == "__main__":
    # Small shapes consistent with the module: vocab=50, embed=16, hidden=32,
    # seq=8, batch=4.  (GRU dropout is a no-op for n_layers=1, as in PyTorch.)
    VOCAB, E, H, T, B = 50, 16, 32, 8, 4

    key = jax.random.PRNGKey(0)
    pkey, skey = jax.random.split(key)
    params = init_params(pkey, VOCAB, E, H)
    src = jax.random.randint(skey, (T, B), 0, VOCAB, dtype=jnp.int32)

    fwd = jax.jit(encoder_forward)
    outputs, hidden = fwd(src, params)
    outputs = jax.block_until_ready(outputs)
    hidden = jax.block_until_ready(hidden)

    ref_out, ref_hid = reference_forward(src, params)
    assert outputs.shape == (T, B, H) and hidden.shape == (2, B, H)
    # bf16 gi + bf16 operands in the recurrent matmul (f32 accumulation) ->
    # slightly looser tolerance than pure-f32; still catches logic/index errors.
    assert jnp.allclose(outputs, ref_out, atol=5e-3, rtol=5e-3), \
        float(jnp.max(jnp.abs(outputs - ref_out)))
    assert jnp.allclose(hidden, ref_hid, atol=5e-3, rtol=5e-3), \
        float(jnp.max(jnp.abs(hidden - ref_hid)))

    print("KERNEL_OK")
</pallas_src>

<mosaic_0001>
module attributes {stable_mosaic.version = 11 : i64} {
  func.func @encoder_gru_kernel(%arg0: i32, %arg1: memref<8x8x192xbf16, #tpu.memory_space<vmem>>, %arg2: memref<64x192xbf16, #tpu.memory_space<vmem>>, %arg3: memref<1x192xf32, #tpu.memory_space<vmem>>, %arg4: memref<8x8x32xf32, #tpu.memory_space<vmem>>, %arg5: memref<2x8x32xf32, #tpu.memory_space<vmem>>, %arg6: memref<8x8x64xf32, #tpu.memory_space<vmem>>) attributes {dimension_semantics = [#tpu.dimension_semantics<arbitrary>], iteration_bounds = array<i64: 1>, scalar_prefetch = 0 : i64, scratch_operands = 1 : i64, tpu.core_type = #tpu.core_type<tc>, window_params = [{pipeline_mode = #tpu.pipeline_mode<synchronous>, transform_indices = @transform_0, window_bounds = array<i64: 8, 8, 192>}, {pipeline_mode = #tpu.pipeline_mode<synchronous>, transform_indices = @transform_1, window_bounds = array<i64: 64, 192>}, {pipeline_mode = #tpu.pipeline_mode<synchronous>, transform_indices = @transform_2, window_bounds = array<i64: 1, 192>}, {pipeline_mode = #tpu.pipeline_mode<synchronous>, transform_indices = @transform_3, window_bounds = array<i64: 8, 8, 32>}, {pipeline_mode = #tpu.pipeline_mode<synchronous>, transform_indices = @transform_4, window_bounds = array<i64: 2, 8, 32>}]} {
    %c0 = arith.constant 0 : index
    %c0_0 = arith.constant 0 : index
    %0 = vector.load %arg2[%c0, %c0_0] : memref<64x192xbf16, #tpu.memory_space<vmem>>, vector<64x192xbf16>
    %c0_1 = arith.constant 0 : index
    %c0_2 = arith.constant 0 : index
    %1 = vector.load %arg3[%c0_1, %c0_2] : memref<1x192xf32, #tpu.memory_space<vmem>>, vector<1x192xf32>
    %cst = arith.constant 0.000000e+00 : f32
    %2 = vector.broadcast %cst : f32 to vector<8x64xf32>
    %c0_i32 = arith.constant 0 : i32
    %3 = arith.index_cast %c0_i32 : i32 to index
    %c0_3 = arith.constant 0 : index
    %c0_4 = arith.constant 0 : index
    %4 = vector.load %arg1[%3, %c0_3, %c0_4] : memref<8x8x192xbf16, #tpu.memory_space<vmem>>, vector<1x8x192xbf16>
    %5 = vector.shape_cast %4 : vector<1x8x192xbf16> to vector<8x192xbf16>
    %6 = arith.extf %5 : vector<8x192xbf16> to vector<8x192xf32>
    %7 = arith.truncf %2 : vector<8x64xf32> to vector<8x64xbf16>
    %cst_5 = arith.constant dense<0.000000e+00> : vector<8x192xf32>
    %8 = tpu.matmul %7, %0, %cst_5 {dimension_numbers = #tpu.dot_dimension_numbers<[1], [0], [0], [1], [0, 0, 1, 1], [], []>} : vector<8x64xbf16>, vector<64x192xbf16>, vector<8x192xf32> -> vector<8x192xf32>
    %9 = vector.broadcast %1 : vector<1x192xf32> to vector<8x192xf32>
    %10 = arith.addf %8, %9 : vector<8x192xf32>
    %11 = vector.extract_strided_slice %6 {offsets = [0, 0], sizes = [8, 128], strides = [1, 1]} : vector<8x192xf32> to vector<8x128xf32>
    %12 = vector.extract_strided_slice %10 {offsets = [0, 0], sizes = [8, 128], strides = [1, 1]} : vector<8x192xf32> to vector<8x128xf32>
    %13 = arith.addf %11, %12 : vector<8x128xf32>
    %14 = arith.negf %13 : vector<8x128xf32>
    %15 = math.exp %14 : vector<8x128xf32>
    %cst_6 = arith.constant 1.000000e+00 : f32
    %16 = vector.broadcast %cst_6 : f32 to vector<8x128xf32>
    %17 = arith.addf %16, %15 : vector<8x128xf32>
    %18 = arith.divf %16, %17 : vector<8x128xf32>
    %19 = vector.extract_strided_slice %18 {offsets = [0, 0], sizes = [8, 64], strides = [1, 1]} : vector<8x128xf32> to vector<8x64xf32>
    %20 = vector.extract_strided_slice %18 {offsets = [0, 64], sizes = [8, 64], strides = [1, 1]} : vector<8x128xf32> to vector<8x64xf32>
    %21 = vector.extract_strided_slice %6 {offsets = [0, 128], sizes = [8, 64], strides = [1, 1]} : vector<8x192xf32> to vector<8x64xf32>
    %22 = vector.extract_strided_slice %10 {offsets = [0, 128], sizes = [8, 64], strides = [1, 1]} : vector<8x192xf32> to vector<8x64xf32>
    %23 = arith.mulf %19, %22 : vector<8x64xf32>
    %24 = arith.addf %21, %23 : vector<8x64xf32>
    %25 = math.tanh %24 : vector<8x64xf32>
    %cst_7 = arith.constant 1.000000e+00 : f32
    %26 = vector.broadcast %cst_7 : f32 to vector<8x64xf32>
    %27 = arith.subf %26, %20 : vector<8x64xf32>
    %28 = arith.mulf %27, %25 : vector<8x64xf32>
    %29 = arith.mulf %20, %2 : vector<8x64xf32>
    %30 = arith.addf %28, %29 : vector<8x64xf32>
    %31 = arith.index_cast %c0_i32 : i32 to index
    %c0_8 = arith.constant 0 : index
    %c0_9 = arith.constant 0 : index
    %32 = vector.load %arg6[%31, %c0_8, %c0_9] : memref<8x8x64xf32, #tpu.memory_space<vmem>>, vector<1x8x64xf32>
    %33 = vector.shape_cast %32 : vector<1x8x64xf32> to vector<8x64xf32>
    %34 = vector.shape_cast %30 : vector<8x64xf32> to vector<1x8x64xf32>
    tpu.vector_store %arg6[%31, %c0_8, %c0_9], %34 {strides = array<i32>} : memref<8x8x64xf32, #tpu.memory_space<vmem>>, vector<1x8x64xf32>,
    %c1_i32 = arith.constant 1 : i32
    %35 = arith.index_cast %c1_i32 : i32 to index
    %c0_10 = arith.constant 0 : index
    %c0_11 = arith.constant 0 : index
    %36 = vector.load %arg1[%35, %c0_10, %c0_11] : memref<8x8x192xbf16, #tpu.memory_space<vmem>>, vector<1x8x192xbf16>
    %37 = vector.shape_cast %36 : vector<1x8x192xbf16> to vector<8x192xbf16>
    %38 = arith.extf %37 : vector<8x192xbf16> to vector<8x192xf32>
    %39 = arith.truncf %30 : vector<8x64xf32> to vector<8x64xbf16>
    %cst_12 = arith.constant dense<0.000000e+00> : vector<8x192xf32>
    %40 = tpu.matmul %39, %0, %cst_12 {dimension_numbers = #tpu.dot_dimension_numbers<[1], [0], [0], [1], [0, 0, 1, 1], [], []>} : vector<8x64xbf16>, vector<64x192xbf16>, vector<8x192xf32> -> vector<8x192xf32>
    %41 = vector.broadcast %1 : vector<1x192xf32> to vector<8x192xf32>
    %42 = arith.addf %40, %41 : vector<8x192xf32>
    %43 = vector.extract_strided_slice %38 {offsets = [0, 0], sizes = [8, 128], strides = [1, 1]} : vector<8x192xf32> to vector<8x128xf32>
    %44 = vector.extract_strided_slice %42 {offsets = [0, 0], sizes = [8, 128], strides = [1, 1]} : vector<8x192xf32> to vector<8x128xf32>
    %45 = arith.addf %43, %44 : vector<8x128xf32>
    %46 = arith.negf %45 : vector<8x128xf32>
    %47 = math.exp %46 : vector<8x128xf32>
    %cst_13 = arith.constant 1.000000e+00 : f32
    %48 = vector.broadcast %cst_13 : f32 to vector<8x128xf32>
    %49 = arith.addf %48, %47 : vector<8x128xf32>
    %50 = arith.divf %48, %49 : vector<8x128xf32>
    %51 = vector.extract_strided_slice %50 {offsets = [0, 0], sizes = [8, 64], strides = [1, 1]} : vector<8x128xf32> to vector<8x64xf32>
    %52 = vector.extract_strided_slice %50 {offsets = [0, 64], sizes = [8, 64], strides = [1, 1]} : vector<8x128xf32> to vector<8x64xf32>
    %53 = vector.extract_strided_slice %38 {offsets = [0, 128], sizes = [8, 64], strides = [1, 1]} : vector<8x192xf32> to vector<8x64xf32>
    %54 = vector.extract_strided_slice %42 {offsets = [0, 128], sizes = [8, 64], strides = [1, 1]} : vector<8x192xf32> to vector<8x64xf32>
    %55 = arith.mulf %51, %54 : vector<8x64xf32>
    %56 = arith.addf %53, %55 : vector<8x64xf32>
    %57 = math.tanh %56 : vector<8x64xf32>
    %cst_14 = arith.constant 1.000000e+00 : f32
    %58 = vector.broadcast %cst_14 : f32 to vector<8x64xf32>
    %59 = arith.subf %58, %52 : vector<8x64xf32>
    %60 = arith.mulf %59, %57 : vector<8x64xf32>
    %61 = arith.mulf %52, %30 : vector<8x64xf32>
    %62 = arith.addf %60, %61 : vector<8x64xf32>
    %63 = arith.index_cast %c1_i32 : i32 to index
    %c0_15 = arith.constant 0 : index
    %c0_16 = arith.constant 0 : index
    %64 = vector.load %arg6[%63, %c0_15, %c0_16] : memref<8x8x64xf32, #tpu.memory_space<vmem>>, vector<1x8x64xf32>
    %65 = vector.shape_cast %64 : vector<1x8x64xf32> to vector<8x64xf32>
    %66 = vector.shape_cast %62 : vector<8x64xf32> to vector<1x8x64xf32>
    tpu.vector_store %arg6[%63, %c0_15, %c0_16], %66 {strides = array<i32>} : memref<8x8x64xf32, #tpu.memory_space<vmem>>, vector<1x8x64xf32>,
    %c2_i32 = arith.constant 2 : i32
    %67 = arith.index_cast %c2_i32 : i32 to index
    %c0_17 = arith.constant 0 : index
    %c0_18 = arith.constant 0 : index
    %68 = vector.load %arg1[%67, %c0_17, %c0_18] : memref<8x8x192xbf16, #tpu.memory_space<vmem>>, vector<1x8x192xbf16>
    %69 = vector.shape_cast %68 : vector<1x8x192xbf16> to vector<8x192xbf16>
    %70 = arith.extf %69 : vector<8x192xbf16> to vector<8x192xf32>
    %71 = arith.truncf %62 : vector<8x64xf32> to vector<8x64xbf16>
    %cst_19 = arith.constant dense<0.000000e+00> : vector<8x192xf32>
    %72 = tpu.matmul %71, %0, %cst_19 {dimension_numbers = #tpu.dot_dimension_numbers<[1], [0], [0], [1], [0, 0, 1, 1], [], []>} : vector<8x64xbf16>, vector<64x192xbf16>, vector<8x192xf32> -> vector<8x192xf32>
    %73 = vector.broadcast %1 : vector<1x192xf32> to vector<8x192xf32>
    %74 = arith.addf %72, %73 : vector<8x192xf32>
    %75 = vector.extract_strided_slice %70 {offsets = [0, 0], sizes = [8, 128], strides = [1, 1]} : vector<8x192xf32> to vector<8x128xf32>
    %76 = vector.extract_strided_slice %74 {offsets = [0, 0], sizes = [8, 128], strides = [1, 1]} : vector<8x192xf32> to vector<8x128xf32>
    %77 = arith.addf %75, %76 : vector<8x128xf32>
    %78 = arith.negf %77 : vector<8x128xf32>
    %79 = math.exp %78 : vector<8x128xf32>
    %cst_20 = arith.constant 1.000000e+00 : f32
    %80 = vector.broadcast %cst_20 : f32 to vector<8x128xf32>
    %81 = arith.addf %80, %79 : vector<8x128xf32>
    %82 = arith.divf %80, %81 : vector<8x128xf32>
    %83 = vector.extract_strided_slice %82 {offsets = [0, 0], sizes = [8, 64], strides = [1, 1]} : vector<8x128xf32> to vector<8x64xf32>
    %84 = vector.extract_strided_slice %82 {offsets = [0, 64], sizes = [8, 64], strides = [1, 1]} : vector<8x128xf32> to vector<8x64xf32>
    %85 = vector.extract_strided_slice %70 {offsets = [0, 128], sizes = [8, 64], strides = [1, 1]} : vector<8x192xf32> to vector<8x64xf32>
    %86 = vector.extract_strided_slice %74 {offsets = [0, 128], sizes = [8, 64], strides = [1, 1]} : vector<8x192xf32> to vector<8x64xf32>
    %87 = arith.mulf %83, %86 : vector<8x64xf32>
    %88 = arith.addf %85, %87 : vector<8x64xf32>
    %89 = math.tanh %88 : vector<8x64xf32>
    %cst_21 = arith.constant 1.000000e+00 : f32
    %90 = vector.broadcast %cst_21 : f32 to vector<8x64xf32>
    %91 = arith.subf %90, %84 : vector<8x64xf32>
    %92 = arith.mulf %91, %89 : vector<8x64xf32>
    %93 = arith.mulf %84, %62 : vector<8x64xf32>
    %94 = arith.addf %92, %93 : vector<8x64xf32>
    %95 = arith.index_cast %c2_i32 : i32 to index
    %c0_22 = arith.constant 0 : index
    %c0_23 = arith.constant 0 : index
    %96 = vector.load %arg6[%95, %c0_22, %c0_23] : memref<8x8x64xf32, #tpu.memory_space<vmem>>, vector<1x8x64xf32>
    %97 = vector.shape_cast %96 : vector<1x8x64xf32> to vector<8x64xf32>
    %98 = vector.shape_cast %94 : vector<8x64xf32> to vector<1x8x64xf32>
    tpu.vector_store %arg6[%95, %c0_22, %c0_23], %98 {strides = array<i32>} : memref<8x8x64xf32, #tpu.memory_space<vmem>>, vector<1x8x64xf32>,
    %c3_i32 = arith.constant 3 : i32
    %99 = arith.index_cast %c3_i32 : i32 to index
    %c0_24 = arith.constant 0 : index
    %c0_25 = arith.constant 0 : index
    %100 = vector.load %arg1[%99, %c0_24, %c0_25] : memref<8x8x192xbf16, #tpu.memory_space<vmem>>, vector<1x8x192xbf16>
    %101 = vector.shape_cast %100 : vector<1x8x192xbf16> to vector<8x192xbf16>
    %102 = arith.extf %101 : vector<8x192xbf16> to vector<8x192xf32>
    %103 = arith.truncf %94 : vector<8x64xf32> to vector<8x64xbf16>
    %cst_26 = arith.constant dense<0.000000e+00> : vector<8x192xf32>
    %104 = tpu.matmul %103, %0, %cst_26 {dimension_numbers = #tpu.dot_dimension_numbers<[1], [0], [0], [1], [0, 0, 1, 1], [], []>} : vector<8x64xbf16>, vector<64x192xbf16>, vector<8x192xf32> -> vector<8x192xf32>
    %105 = vector.broadcast %1 : vector<1x192xf32> to vector<8x192xf32>
    %106 = arith.addf %104, %105 : vector<8x192xf32>
    %107 = vector.extract_strided_slice %102 {offsets = [0, 0], sizes = [8, 128], strides = [1, 1]} : vector<8x192xf32> to vector<8x128xf32>
    %108 = vector.extract_strided_slice %106 {offsets = [0, 0], sizes = [8, 128], strides = [1, 1]} : vector<8x192xf32> to vector<8x128xf32>
    %109 = arith.addf %107, %108 : vector<8x128xf32>
    %110 = arith.negf %109 : vector<8x128xf32>
    %111 = math.exp %110 : vector<8x128xf32>
    %cst_27 = arith.constant 1.000000e+00 : f32
    %112 = vector.broadcast %cst_27 : f32 to vector<8x128xf32>
    %113 = arith.addf %112, %111 : vector<8x128xf32>
    %114 = arith.divf %112, %113 : vector<8x128xf32>
    %115 = vector.extract_strided_slice %114 {offsets = [0, 0], sizes = [8, 64], strides = [1, 1]} : vector<8x128xf32> to vector<8x64xf32>
    %116 = vector.extract_strided_slice %114 {offsets = [0, 64], sizes = [8, 64], strides = [1, 1]} : vector<8x128xf32> to vector<8x64xf32>
    %117 = vector.extract_strided_slice %102 {offsets = [0, 128], sizes = [8, 64], strides = [1, 1]} : vector<8x192xf32> to vector<8x64xf32>
    %118 = vector.extract_strided_slice %106 {offsets = [0, 128], sizes = [8, 64], strides = [1, 1]} : vector<8x192xf32> to vector<8x64xf32>
    %119 = arith.mulf %115, %118 : vector<8x64xf32>
    %120 = arith.addf %117, %119 : vector<8x64xf32>
    %121 = math.tanh %120 : vector<8x64xf32>
    %cst_28 = arith.constant 1.000000e+00 : f32
    %122 = vector.broadcast %cst_28 : f32 to vector<8x64xf32>
    %123 = arith.subf %122, %116 : vector<8x64xf32>
    %124 = arith.mulf %123, %121 : vector<8x64xf32>
    %125 = arith.mulf %116, %94 : vector<8x64xf32>
    %126 = arith.addf %124, %125 : vector<8x64xf32>
    %127 = arith.index_cast %c3_i32 : i32 to index
    %c0_29 = arith.constant 0 : index
    %c0_30 = arith.constant 0 : index
    %128 = vector.load %arg6[%127, %c0_29, %c0_30] : memref<8x8x64xf32, #tpu.memory_space<vmem>>, vector<1x8x64xf32>
    %129 = vector.shape_cast %128 : vector<1x8x64xf32> to vector<8x64xf32>
    %130 = vector.shape_cast %126 : vector<8x64xf32> to vector<1x8x64xf32>
    tpu.vector_store %arg6[%127, %c0_29, %c0_30], %130 {strides = array<i32>} : memref<8x8x64xf32, #tpu.memory_space<vmem>>, vector<1x8x64xf32>,
    %c4_i32 = arith.constant 4 : i32
    %131 = arith.index_cast %c4_i32 : i32 to index
    %c0_31 = arith.constant 0 : index
    %c0_32 = arith.constant 0 : index
    %132 = vector.load %arg1[%131, %c0_31, %c0_32] : memref<8x8x192xbf16, #tpu.memory_space<vmem>>, vector<1x8x192xbf16>
    %133 = vector.shape_cast %132 : vector<1x8x192xbf16> to vector<8x192xbf16>
    %134 = arith.extf %133 : vector<8x192xbf16> to vector<8x192xf32>
    %135 = arith.truncf %126 : vector<8x64xf32> to vector<8x64xbf16>
    %cst_33 = arith.constant dense<0.000000e+00> : vector<8x192xf32>
    %136 = tpu.matmul %135, %0, %cst_33 {dimension_numbers = #tpu.dot_dimension_numbers<[1], [0], [0], [1], [0, 0, 1, 1], [], []>} : vector<8x64xbf16>, vector<64x192xbf16>, vector<8x192xf32> -> vector<8x192xf32>
    %137 = vector.broadcast %1 : vector<1x192xf32> to vector<8x192xf32>
    %138 = arith.addf %136, %137 : vector<8x192xf32>
    %139 = vector.extract_strided_slice %134 {offsets = [0, 0], sizes = [8, 128], strides = [1, 1]} : vector<8x192xf32> to vector<8x128xf32>
    %140 = vector.extract_strided_slice %138 {offsets = [0, 0], sizes = [8, 128], strides = [1, 1]} : vector<8x192xf32> to vector<8x128xf32>
    %141 = arith.addf %139, %140 : vector<8x128xf32>
    %142 = arith.negf %141 : vector<8x128xf32>
    %143 = math.exp %142 : vector<8x128xf32>
    %cst_34 = arith.constant 1.000000e+00 : f32
    %144 = vector.broadcast %cst_34 : f32 to vector<8x128xf32>
    %145 = arith.addf %144, %143 : vector<8x128xf32>
    %146 = arith.divf %144, %145 : vector<8x128xf32>
    %147 = vector.extract_strided_slice %146 {offsets = [0, 0], sizes = [8, 64], strides = [1, 1]} : vector<8x128xf32> to vector<8x64xf32>
    %148 = vector.extract_strided_slice %146 {offsets = [0, 64], sizes = [8, 64], strides = [1, 1]} : vector<8x128xf32> to vector<8x64xf32>
    %149 = vector.extract_strided_slice %134 {offsets = [0, 128], sizes = [8, 64], strides = [1, 1]} : vector<8x192xf32> to vector<8x64xf32>
    %150 = vector.extract_strided_slice %138 {offsets = [0, 128], sizes = [8, 64], strides = [1, 1]} : vector<8x192xf32> to vector<8x64xf32>
    %151 = arith.mulf %147, %150 : vector<8x64xf32>
    %152 = arith.addf %149, %151 : vector<8x64xf32>
    %153 = math.tanh %152 : vector<8x64xf32>
    %cst_35 = arith.constant 1.000000e+00 : f32
    %154 = vector.broadcast %cst_35 : f32 to vector<8x64xf32>
    %155 = arith.subf %154, %148 : vector<8x64xf32>
    %156 = arith.mulf %155, %153 : vector<8x64xf32>
    %157 = arith.mulf %148, %126 : vector<8x64xf32>
    %158 = arith.addf %156, %157 : vector<8x64xf32>
    %159 = arith.index_cast %c4_i32 : i32 to index
    %c0_36 = arith.constant 0 : index
    %c0_37 = arith.constant 0 : index
    %160 = vector.load %arg6[%159, %c0_36, %c0_37] : memref<8x8x64xf32, #tpu.memory_space<vmem>>, vector<1x8x64xf32>
    %161 = vector.shape_cast %160 : vector<1x8x64xf32> to vector<8x64xf32>
    %162 = vector.shape_cast %158 : vector<8x64xf32> to vector<1x8x64xf32>
    tpu.vector_store %arg6[%159, %c0_36, %c0_37], %162 {strides = array<i32>} : memref<8x8x64xf32, #tpu.memory_space<vmem>>, vector<1x8x64xf32>,
    %c5_i32 = arith.constant 5 : i32
    %163 = arith.index_cast %c5_i32 : i32 to index
    %c0_38 = arith.constant 0 : index
    %c0_39 = arith.constant 0 : index
    %164 = vector.load %arg1[%163, %c0_38, %c0_39] : memref<8x8x192xbf16, #tpu.memory_space<vmem>>, vector<1x8x192xbf16>
    %165 = vector.shape_cast %164 : vector<1x8x192xbf16> to vector<8x192xbf16>
    %166 = arith.extf %165 : vector<8x192xbf16> to vector<8x192xf32>
    %167 = arith.truncf %158 : vector<8x64xf32> to vector<8x64xbf16>
    %cst_40 = arith.constant dense<0.000000e+00> : vector<8x192xf32>
    %168 = tpu.matmul %167, %0, %cst_40 {dimension_numbers = #tpu.dot_dimension_numbers<[1], [0], [0], [1], [0, 0, 1, 1], [], []>} : vector<8x64xbf16>, vector<64x192xbf16>, vector<8x192xf32> -> vector<8x192xf32>
    %169 = vector.broadcast %1 : vector<1x192xf32> to vector<8x192xf32>
    %170 = arith.addf %168, %169 : vector<8x192xf32>
    %171 = vector.extract_strided_slice %166 {offsets = [0, 0], sizes = [8, 128], strides = [1, 1]} : vector<8x192xf32> to vector<8x128xf32>
    %172 = vector.extract_strided_slice %170 {offsets = [0, 0], sizes = [8, 128], strides = [1, 1]} : vector<8x192xf32> to vector<8x128xf32>
    %173 = arith.addf %171, %172 : vector<8x128xf32>
    %174 = arith.negf %173 : vector<8x128xf32>
    %175 = math.exp %174 : vector<8x128xf32>
    %cst_41 = arith.constant 1.000000e+00 : f32
    %176 = vector.broadcast %cst_41 : f32 to vector<8x128xf32>
    %177 = arith.addf %176, %175 : vector<8x128xf32>
    %178 = arith.divf %176, %177 : vector<8x128xf32>
    %179 = vector.extract_strided_slice %178 {offsets = [0, 0], sizes = [8, 64], strides = [1, 1]} : vector<8x128xf32> to vector<8x64xf32>
    %180 = vector.extract_strided_slice %178 {offsets = [0, 64], sizes = [8, 64], strides = [1, 1]} : vector<8x128xf32> to vector<8x64xf32>
    %181 = vector.extract_strided_slice %166 {offsets = [0, 128], sizes = [8, 64], strides = [1, 1]} : vector<8x192xf32> to vector<8x64xf32>
    %182 = vector.extract_strided_slice %170 {offsets = [0, 128], sizes = [8, 64], strides = [1, 1]} : vector<8x192xf32> to vector<8x64xf32>
    %183 = arith.mulf %179, %182 : vector<8x64xf32>
    %184 = arith.addf %181, %183 : vector<8x64xf32>
    %185 = math.tanh %184 : vector<8x64xf32>
    %cst_42 = arith.constant 1.000000e+00 : f32
    %186 = vector.broadcast %cst_42 : f32 to vector<8x64xf32>
    %187 = arith.subf %186, %180 : vector<8x64xf32>
    %188 = arith.mulf %187, %185 : vector<8x64xf32>
    %189 = arith.mulf %180, %158 : vector<8x64xf32>
    %190 = arith.addf %188, %189 : vector<8x64xf32>
    %191 = arith.index_cast %c5_i32 : i32 to index
    %c0_43 = arith.constant 0 : index
    %c0_44 = arith.constant 0 : index
    %192 = vector.load %arg6[%191, %c0_43, %c0_44] : memref<8x8x64xf32, #tpu.memory_space<vmem>>, vector<1x8x64xf32>
    %193 = vector.shape_cast %192 : vector<1x8x64xf32> to vector<8x64xf32>
    %194 = vector.shape_cast %190 : vector<8x64xf32> to vector<1x8x64xf32>
    tpu.vector_store %arg6[%191, %c0_43, %c0_44], %194 {strides = array<i32>} : memref<8x8x64xf32, #tpu.memory_space<vmem>>, vector<1x8x64xf32>,
    %c6_i32 = arith.constant 6 : i32
    %195 = arith.index_cast %c6_i32 : i32 to index
    %c0_45 = arith.constant 0 : index
    %c0_46 = arith.constant 0 : index
    %196 = vector.load %arg1[%195, %c0_45, %c0_46] : memref<8x8x192xbf16, #tpu.memory_space<vmem>>, vector<1x8x192xbf16>
    %197 = vector.shape_cast %196 : vector<1x8x192xbf16> to vector<8x192xbf16>
    %198 = arith.extf %197 : vector<8x192xbf16> to vector<8x192xf32>
    %199 = arith.truncf %190 : vector<8x64xf32> to vector<8x64xbf16>
    %cst_47 = arith.constant dense<0.000000e+00> : vector<8x192xf32>
    %200 = tpu.matmul %199, %0, %cst_47 {dimension_numbers = #tpu.dot_dimension_numbers<[1], [0], [0], [1], [0, 0, 1, 1], [], []>} : vector<8x64xbf16>, vector<64x192xbf16>, vector<8x192xf32> -> vector<8x192xf32>
    %201 = vector.broadcast %1 : vector<1x192xf32> to vector<8x192xf32>
    %202 = arith.addf %200, %201 : vector<8x192xf32>
    %203 = vector.extract_strided_slice %198 {offsets = [0, 0], sizes = [8, 128], strides = [1, 1]} : vector<8x192xf32> to vector<8x128xf32>
    %204 = vector.extract_strided_slice %202 {offsets = [0, 0], sizes = [8, 128], strides = [1, 1]} : vector<8x192xf32> to vector<8x128xf32>
    %205 = arith.addf %203, %204 : vector<8x128xf32>
    %206 = arith.negf %205 : vector<8x128xf32>
    %207 = math.exp %206 : vector<8x128xf32>
    %cst_48 = arith.constant 1.000000e+00 : f32
    %208 = vector.broadcast %cst_48 : f32 to vector<8x128xf32>
    %209 = arith.addf %208, %207 : vector<8x128xf32>
    %210 = arith.divf %208, %209 : vector<8x128xf32>
    %211 = vector.extract_strided_slice %210 {offsets = [0, 0], sizes = [8, 64], strides = [1, 1]} : vector<8x128xf32> to vector<8x64xf32>
    %212 = vector.extract_strided_slice %210 {offsets = [0, 64], sizes = [8, 64], strides = [1, 1]} : vector<8x128xf32> to vector<8x64xf32>
    %213 = vector.extract_strided_slice %198 {offsets = [0, 128], sizes = [8, 64], strides = [1, 1]} : vector<8x192xf32> to vector<8x64xf32>
    %214 = vector.extract_strided_slice %202 {offsets = [0, 128], sizes = [8, 64], strides = [1, 1]} : vector<8x192xf32> to vector<8x64xf32>
    %215 = arith.mulf %211, %214 : vector<8x64xf32>
    %216 = arith.addf %213, %215 : vector<8x64xf32>
    %217 = math.tanh %216 : vector<8x64xf32>
    %cst_49 = arith.constant 1.000000e+00 : f32
    %218 = vector.broadcast %cst_49 : f32 to vector<8x64xf32>
    %219 = arith.subf %218, %212 : vector<8x64xf32>
    %220 = arith.mulf %219, %217 : vector<8x64xf32>
    %221 = arith.mulf %212, %190 : vector<8x64xf32>
    %222 = arith.addf %220, %221 : vector<8x64xf32>
    %223 = arith.index_cast %c6_i32 : i32 to index
    %c0_50 = arith.constant 0 : index
    %c0_51 = arith.constant 0 : index
    %224 = vector.load %arg6[%223, %c0_50, %c0_51] : memref<8x8x64xf32, #tpu.memory_space<vmem>>, vector<1x8x64xf32>
    %225 = vector.shape_cast %224 : vector<1x8x64xf32> to vector<8x64xf32>
    %226 = vector.shape_cast %222 : vector<8x64xf32> to vector<1x8x64xf32>
    tpu.vector_store %arg6[%223, %c0_50, %c0_51], %226 {strides = array<i32>} : memref<8x8x64xf32, #tpu.memory_space<vmem>>, vector<1x8x64xf32>,
    %c7_i32 = arith.constant 7 : i32
    %227 = arith.index_cast %c7_i32 : i32 to index
    %c0_52 = arith.constant 0 : index
    %c0_53 = arith.constant 0 : index
    %228 = vector.load %arg1[%227, %c0_52, %c0_53] : memref<8x8x192xbf16, #tpu.memory_space<vmem>>, vector<1x8x192xbf16>
    %229 = vector.shape_cast %228 : vector<1x8x192xbf16> to vector<8x192xbf16>
    %230 = arith.extf %229 : vector<8x192xbf16> to vector<8x192xf32>
    %231 = arith.truncf %222 : vector<8x64xf32> to vector<8x64xbf16>
    %cst_54 = arith.constant dense<0.000000e+00> : vector<8x192xf32>
    %232 = tpu.matmul %231, %0, %cst_54 {dimension_numbers = #tpu.dot_dimension_numbers<[1], [0], [0], [1], [0, 0, 1, 1], [], []>} : vector<8x64xbf16>, vector<64x192xbf16>, vector<8x192xf32> -> vector<8x192xf32>
    %233 = vector.broadcast %1 : vector<1x192xf32> to vector<8x192xf32>
    %234 = arith.addf %232, %233 : vector<8x192xf32>
    %235 = vector.extract_strided_slice %230 {offsets = [0, 0], sizes = [8, 128], strides = [1, 1]} : vector<8x192xf32> to vector<8x128xf32>
    %236 = vector.extract_strided_slice %234 {offsets = [0, 0], sizes = [8, 128], strides = [1, 1]} : vector<8x192xf32> to vector<8x128xf32>
    %237 = arith.addf %235, %236 : vector<8x128xf32>
    %238 = arith.negf %237 : vector<8x128xf32>
    %239 = math.exp %238 : vector<8x128xf32>
    %cst_55 = arith.constant 1.000000e+00 : f32
    %240 = vector.broadcast %cst_55 : f32 to vector<8x128xf32>
    %241 = arith.addf %240, %239 : vector<8x128xf32>
    %242 = arith.divf %240, %241 : vector<8x128xf32>
    %243 = vector.extract_strided_slice %242 {offsets = [0, 0], sizes = [8, 64], strides = [1, 1]} : vector<8x128xf32> to vector<8x64xf32>
    %244 = vector.extract_strided_slice %242 {offsets = [0, 64], sizes = [8, 64], strides = [1, 1]} : vector<8x128xf32> to vector<8x64xf32>
    %245 = vector.extract_strided_slice %230 {offsets = [0, 128], sizes = [8, 64], strides = [1, 1]} : vector<8x192xf32> to vector<8x64xf32>
    %246 = vector.extract_strided_slice %234 {offsets = [0, 128], sizes = [8, 64], strides = [1, 1]} : vector<8x192xf32> to vector<8x64xf32>
    %247 = arith.mulf %243, %246 : vector<8x64xf32>
    %248 = arith.addf %245, %247 : vector<8x64xf32>
    %249 = math.tanh %248 : vector<8x64xf32>
    %cst_56 = arith.constant 1.000000e+00 : f32
    %250 = vector.broadcast %cst_56 : f32 to vector<8x64xf32>
    %251 = arith.subf %250, %244 : vector<8x64xf32>
    %252 = arith.mulf %251, %249 : vector<8x64xf32>
    %253 = arith.mulf %244, %222 : vector<8x64xf32>
    %254 = arith.addf %252, %253 : vector<8x64xf32>
    %255 = arith.index_cast %c7_i32 : i32 to index
    %c0_57 = arith.constant 0 : index
    %c0_58 = arith.constant 0 : index
    %256 = vector.load %arg6[%255, %c0_57, %c0_58] : memref<8x8x64xf32, #tpu.memory_space<vmem>>, vector<1x8x64xf32>
    %257 = vector.shape_cast %256 : vector<1x8x64xf32> to vector<8x64xf32>
    %258 = vector.shape_cast %254 : vector<8x64xf32> to vector<1x8x64xf32>
    tpu.vector_store %arg6[%255, %c0_57, %c0_58], %258 {strides = array<i32>} : memref<8x8x64xf32, #tpu.memory_space<vmem>>, vector<1x8x64xf32>,
    %c8_i32 = arith.constant 8 : i32
    %c0_59 = arith.constant 0 : index
    %c0_60 = arith.constant 0 : index
    %c0_61 = arith.constant 0 : index
    %259 = vector.load %arg6[%c0_59, %c0_60, %c0_61] : memref<8x8x64xf32, #tpu.memory_space<vmem>>, vector<8x8x64xf32>
    %260 = vector.extract_strided_slice %259 {offsets = [0, 0, 0], sizes = [1, 8, 32], strides = [1, 1, 1]} : vector<8x8x64xf32> to vector<1x8x32xf32>
    %261 = vector.shape_cast %260 : vector<1x8x32xf32> to vector<8x32xf32>
    %262 = vector.extract_strided_slice %259 {offsets = [7, 0, 32], sizes = [1, 8, 32], strides = [1, 1, 1]} : vector<8x8x64xf32> to vector<1x8x32xf32>
    %263 = vector.shape_cast %262 : vector<1x8x32xf32> to vector<8x32xf32>
    %264 = arith.addf %261, %263 : vector<8x32xf32>
    %c0_62 = arith.constant 0 : index
    %c0_63 = arith.constant 0 : index
    %c0_64 = arith.constant 0 : index
    %265 = vector.load %arg4[%c0_62, %c0_63, %c0_64] : memref<8x8x32xf32, #tpu.memory_space<vmem>>, vector<1x8x32xf32>
    %266 = vector.shape_cast %265 : vector<1x8x32xf32> to vector<8x32xf32>
    %267 = vector.shape_cast %264 : vector<8x32xf32> to vector<1x8x32xf32>
    tpu.vector_store %arg4[%c0_62, %c0_63, %c0_64], %267 {strides = array<i32>} : memref<8x8x32xf32, #tpu.memory_space<vmem>>, vector<1x8x32xf32>,
    %268 = vector.extract_strided_slice %259 {offsets = [1, 0, 0], sizes = [1, 8, 32], strides = [1, 1, 1]} : vector<8x8x64xf32> to vector<1x8x32xf32>
    %269 = vector.shape_cast %268 : vector<1x8x32xf32> to vector<8x32xf32>
    %270 = vector.extract_strided_slice %259 {offsets = [6, 0, 32], sizes = [1, 8, 32], strides = [1, 1, 1]} : vector<8x8x64xf32> to vector<1x8x32xf32>
    %271 = vector.shape_cast %270 : vector<1x8x32xf32> to vector<8x32xf32>
    %272 = arith.addf %269, %271 : vector<8x32xf32>
    %c1 = arith.constant 1 : index
    %c0_65 = arith.constant 0 : index
    %c0_66 = arith.constant 0 : index
    %273 = vector.load %arg4[%c1, %c0_65, %c0_66] : memref<8x8x32xf32, #tpu.memory_space<vmem>>, vector<1x8x32xf32>
    %274 = vector.shape_cast %273 : vector<1x8x32xf32> to vector<8x32xf32>
    %275 = vector.shape_cast %272 : vector<8x32xf32> to vector<1x8x32xf32>
    tpu.vector_store %arg4[%c1, %c0_65, %c0_66], %275 {strides = array<i32>} : memref<8x8x32xf32, #tpu.memory_space<vmem>>, vector<1x8x32xf32>,
    %276 = vector.extract_strided_slice %259 {offsets = [2, 0, 0], sizes = [1, 8, 32], strides = [1, 1, 1]} : vector<8x8x64xf32> to vector<1x8x32xf32>
    %277 = vector.shape_cast %276 : vector<1x8x32xf32> to vector<8x32xf32>
    %278 = vector.extract_strided_slice %259 {offsets = [5, 0, 32], sizes = [1, 8, 32], strides = [1, 1, 1]} : vector<8x8x64xf32> to vector<1x8x32xf32>
    %279 = vector.shape_cast %278 : vector<1x8x32xf32> to vector<8x32xf32>
    %280 = arith.addf %277, %279 : vector<8x32xf32>
    %c2 = arith.constant 2 : index
    %c0_67 = arith.constant 0 : index
    %c0_68 = arith.constant 0 : index
    %281 = vector.load %arg4[%c2, %c0_67, %c0_68] : memref<8x8x32xf32, #tpu.memory_space<vmem>>, vector<1x8x32xf32>
    %282 = vector.shape_cast %281 : vector<1x8x32xf32> to vector<8x32xf32>
    %283 = vector.shape_cast %280 : vector<8x32xf32> to vector<1x8x32xf32>
    tpu.vector_store %arg4[%c2, %c0_67, %c0_68], %283 {strides = array<i32>} : memref<8x8x32xf32, #tpu.memory_space<vmem>>, vector<1x8x32xf32>,
    %284 = vector.extract_strided_slice %259 {offsets = [3, 0, 0], sizes = [1, 8, 32], strides = [1, 1, 1]} : vector<8x8x64xf32> to vector<1x8x32xf32>
    %285 = vector.shape_cast %284 : vector<1x8x32xf32> to vector<8x32xf32>
    %286 = vector.extract_strided_slice %259 {offsets = [4, 0, 32], sizes = [1, 8, 32], strides = [1, 1, 1]} : vector<8x8x64xf32> to vector<1x8x32xf32>
    %287 = vector.shape_cast %286 : vector<1x8x32xf32> to vector<8x32xf32>
    %288 = arith.addf %285, %287 : vector<8x32xf32>
    %c3 = arith.constant 3 : index
    %c0_69 = arith.constant 0 : index
    %c0_70 = arith.constant 0 : index
    %289 = vector.load %arg4[%c3, %c0_69, %c0_70] : memref<8x8x32xf32, #tpu.memory_space<vmem>>, vector<1x8x32xf32>
    %290 = vector.shape_cast %289 : vector<1x8x32xf32> to vector<8x32xf32>
    %291 = vector.shape_cast %288 : vector<8x32xf32> to vector<1x8x32xf32>
    tpu.vector_store %arg4[%c3, %c0_69, %c0_70], %291 {strides = array<i32>} : memref<8x8x32xf32, #tpu.memory_space<vmem>>, vector<1x8x32xf32>,
    %292 = vector.extract_strided_slice %259 {offsets = [4, 0, 0], sizes = [1, 8, 32], strides = [1, 1, 1]} : vector<8x8x64xf32> to vector<1x8x32xf32>
    %293 = vector.shape_cast %292 : vector<1x8x32xf32> to vector<8x32xf32>
    %294 = vector.extract_strided_slice %259 {offsets = [3, 0, 32], sizes = [1, 8, 32], strides = [1, 1, 1]} : vector<8x8x64xf32> to vector<1x8x32xf32>
    %295 = vector.shape_cast %294 : vector<1x8x32xf32> to vector<8x32xf32>
    %296 = arith.addf %293, %295 : vector<8x32xf32>
    %c4 = arith.constant 4 : index
    %c0_71 = arith.constant 0 : index
    %c0_72 = arith.constant 0 : index
    %297 = vector.load %arg4[%c4, %c0_71, %c0_72] : memref<8x8x32xf32, #tpu.memory_space<vmem>>, vector<1x8x32xf32>
    %298 = vector.shape_cast %297 : vector<1x8x32xf32> to vector<8x32xf32>
    %299 = vector.shape_cast %296 : vector<8x32xf32> to vector<1x8x32xf32>
    tpu.vector_store %arg4[%c4, %c0_71, %c0_72], %299 {strides = array<i32>} : memref<8x8x32xf32, #tpu.memory_space<vmem>>, vector<1x8x32xf32>,
    %300 = vector.extract_strided_slice %259 {offsets = [5, 0, 0], sizes = [1, 8, 32], strides = [1, 1, 1]} : vector<8x8x64xf32> to vector<1x8x32xf32>
    %301 = vector.shape_cast %300 : vector<1x8x32xf32> to vector<8x32xf32>
    %302 = vector.extract_strided_slice %259 {offsets = [2, 0, 32], sizes = [1, 8, 32], strides = [1, 1, 1]} : vector<8x8x64xf32> to vector<1x8x32xf32>
    %303 = vector.shape_cast %302 : vector<1x8x32xf32> to vector<8x32xf32>
    %304 = arith.addf %301, %303 : vector<8x32xf32>
    %c5 = arith.constant 5 : index
    %c0_73 = arith.constant 0 : index
    %c0_74 = arith.constant 0 : index
    %305 = vector.load %arg4[%c5, %c0_73, %c0_74] : memref<8x8x32xf32, #tpu.memory_space<vmem>>, vector<1x8x32xf32>
    %306 = vector.shape_cast %305 : vector<1x8x32xf32> to vector<8x32xf32>
    %307 = vector.shape_cast %304 : vector<8x32xf32> to vector<1x8x32xf32>
    tpu.vector_store %arg4[%c5, %c0_73, %c0_74], %307 {strides = array<i32>} : memref<8x8x32xf32, #tpu.memory_space<vmem>>, vector<1x8x32xf32>,
    %308 = vector.extract_strided_slice %259 {offsets = [6, 0, 0], sizes = [1, 8, 32], strides = [1, 1, 1]} : vector<8x8x64xf32> to vector<1x8x32xf32>
    %309 = vector.shape_cast %308 : vector<1x8x32xf32> to vector<8x32xf32>
    %310 = vector.extract_strided_slice %259 {offsets = [1, 0, 32], sizes = [1, 8, 32], strides = [1, 1, 1]} : vector<8x8x64xf32> to vector<1x8x32xf32>
    %311 = vector.shape_cast %310 : vector<1x8x32xf32> to vector<8x32xf32>
    %312 = arith.addf %309, %311 : vector<8x32xf32>
    %c6 = arith.constant 6 : index
    %c0_75 = arith.constant 0 : index
    %c0_76 = arith.constant 0 : index
    %313 = vector.load %arg4[%c6, %c0_75, %c0_76] : memref<8x8x32xf32, #tpu.memory_space<vmem>>, vector<1x8x32xf32>
    %314 = vector.shape_cast %313 : vector<1x8x32xf32> to vector<8x32xf32>
    %315 = vector.shape_cast %312 : vector<8x32xf32> to vector<1x8x32xf32>
    tpu.vector_store %arg4[%c6, %c0_75, %c0_76], %315 {strides = array<i32>} : memref<8x8x32xf32, #tpu.memory_space<vmem>>, vector<1x8x32xf32>,
    %316 = vector.extract_strided_slice %259 {offsets = [7, 0, 0], sizes = [1, 8, 32], strides = [1, 1, 1]} : vector<8x8x64xf32> to vector<1x8x32xf32>
    %317 = vector.shape_cast %316 : vector<1x8x32xf32> to vector<8x32xf32>
    %318 = vector.extract_strided_slice %259 {offsets = [0, 0, 32], sizes = [1, 8, 32], strides = [1, 1, 1]} : vector<8x8x64xf32> to vector<1x8x32xf32>
    %319 = vector.shape_cast %318 : vector<1x8x32xf32> to vector<8x32xf32>
    %320 = arith.addf %317, %319 : vector<8x32xf32>
    %c7 = arith.constant 7 : index
    %c0_77 = arith.constant 0 : index
    %c0_78 = arith.constant 0 : index
    %321 = vector.load %arg4[%c7, %c0_77, %c0_78] : memref<8x8x32xf32, #tpu.memory_space<vmem>>, vector<1x8x32xf32>
    %322 = vector.shape_cast %321 : vector<1x8x32xf32> to vector<8x32xf32>
    %323 = vector.shape_cast %320 : vector<8x32xf32> to vector<1x8x32xf32>
    tpu.vector_store %arg4[%c7, %c0_77, %c0_78], %323 {strides = array<i32>} : memref<8x8x32xf32, #tpu.memory_space<vmem>>, vector<1x8x32xf32>,
    %324 = vector.extract_strided_slice %254 {offsets = [0, 0], sizes = [8, 32], strides = [1, 1]} : vector<8x64xf32> to vector<8x32xf32>
    %c0_79 = arith.constant 0 : index
    %c0_80 = arith.constant 0 : index
    %c0_81 = arith.constant 0 : index
    %325 = vector.load %arg5[%c0_79, %c0_80, %c0_81] : memref<2x8x32xf32, #tpu.memory_space<vmem>>, vector<1x8x32xf32>
    %326 = vector.shape_cast %325 : vector<1x8x32xf32> to vector<8x32xf32>
    %327 = vector.shape_cast %324 : vector<8x32xf32> to vector<1x8x32xf32>
    tpu.vector_store %arg5[%c0_79, %c0_80, %c0_81], %327 {strides = array<i32>} : memref<2x8x32xf32, #tpu.memory_space<vmem>>, vector<1x8x32xf32>,
    %328 = vector.extract_strided_slice %254 {offsets = [0, 32], sizes = [8, 32], strides = [1, 1]} : vector<8x64xf32> to vector<8x32xf32>
    %c1_82 = arith.constant 1 : index
    %c0_83 = arith.constant 0 : index
    %c0_84 = arith.constant 0 : index
    %329 = vector.load %arg5[%c1_82, %c0_83, %c0_84] : memref<2x8x32xf32, #tpu.memory_space<vmem>>, vector<1x8x32xf32>
    %330 = vector.shape_cast %329 : vector<1x8x32xf32> to vector<8x32xf32>
    %331 = vector.shape_cast %328 : vector<8x32xf32> to vector<1x8x32xf32>
    tpu.vector_store %arg5[%c1_82, %c0_83, %c0_84], %331 {strides = array<i32>} : memref<2x8x32xf32, #tpu.memory_space<vmem>>, vector<1x8x32xf32>,
    return
  }
  func.func @transform_0(%arg0: i32) -> (i32, i32, i32) {
    %c0_i32 = arith.constant 0 : i32
    %c0_i32_0 = arith.constant 0 : i32
    %c0_i32_1 = arith.constant 0 : i32
    %c0_i32_2 = arith.constant 0 : i32
    return %c0_i32, %c0_i32_0, %c0_i32_1 : i32, i32, i32
  }
  func.func @transform_1(%arg0: i32) -> (i32, i32) {
    %c0_i32 = arith.constant 0 : i32
    %c0_i32_0 = arith.constant 0 : i32
    %c0_i32_1 = arith.constant 0 : i32
    return %c0_i32, %c0_i32_0 : i32, i32
  }
  func.func @transform_2(%arg0: i32) -> (i32, i32) {
    %c0_i32 = arith.constant 0 : i32
    %c0_i32_0 = arith.constant 0 : i32
    %c0_i32_1 = arith.constant 0 : i32
    return %c0_i32, %c0_i32_0 : i32, i32
  }
  func.func @transform_3(%arg0: i32) -> (i32, i32, i32) {
    %c0_i32 = arith.constant 0 : i32
    %c0_i32_0 = arith.constant 0 : i32
    %c0_i32_1 = arith.constant 0 : i32
    %c0_i32_2 = arith.constant 0 : i32
    return %c0_i32, %c0_i32_0, %c0_i32_1 : i32, i32, i32
  }
  func.func @transform_4(%arg0: i32) -> (i32, i32, i32) {
    %c0_i32 = arith.constant 0 : i32
    %c0_i32_0 = arith.constant 0 : i32
    %c0_i32_1 = arith.constant 0 : i32
    %c0_i32_2 = arith.constant 0 : i32
    return %c0_i32, %c0_i32_0, %c0_i32_1 : i32, i32, i32
  }
}

</mosaic_0001>

<bundles_post_ra>
// kernel: tile.6
= control target key start
LH: loop header
LB: loop body
LE: loop exit
PB: predicated region body
PF: predicated region fallthrough
CT: control target
= control target key end

     0   :  { %v14_v2 = vmov 0   ;;  %s31_s0 = inlined_call_operand.vmem [shape: pred[64], index: 0, kind: input, shape index: {}]   ;;  %s32_s1 = inlined_call_operand.vmem [shape: pred[3,64], index: 1, kind: output, shape index: {}]  }
   0x1   :  { %v4_v0 = vld [vmem:[%s31_s0] ss:$0 sm:$0xff] }
   0x2   :  { %v7_v1 = vand.u32 255, %v4_v0 }
   0x4   :  { %v8_v3 = vpack.c.b16 %v14_v2, %v7_v1 }
   0x6   :  { %v9_v4 = vpack.c.b8 %v14_v2, %v8_v3 }
   0x8   :  { %12 = vst [vmem:[%s32_s1] sm:$0x1] %v9_v4 }

// kernel: tile.7
= control target key start
LH: loop header
LB: loop body
LE: loop exit
PB: predicated region body
PF: predicated region fallthrough
CT: control target
= control target key end

     0   :  { %vm21_vm0 = vcmask 523264   ;;  %s42_s8 = smov 64   ;;  %vm27_vm1 = vcmask 1048064   ;;  %v43_v6 = vmov 0   ;;  %s60_s0 = inlined_call_operand.vmem [shape: pred[3,64], index: 0, kind: input, shape index: {}]   ;;  %s61_s1 = inlined_call_operand.vmem [shape: pred[192], index: 1, kind: output, shape index: {}]  }
   0x1   :  { %v13_v0 = vld [vmem:[%s60_s0] sm:$0x1]  ;;  %s19_s0 = smov 3 }
   0x2   :  { %v14_v1 = vunpack.c.0.s8 %v13_v0 }
   0x4   :  { %18 = vst [vmem:[#allocation1] sm:$0xf] %v14_v1 }
   0xb   :  { %v24_v2 = vld [vmem:[#allocation1 + $0x1] sm:$0x1]   ;;  %v20_v3 = vld [vmem:[#allocation1] ss:$2 sm:%s19_s0]  }
   0xc   :  { %25 = vrot.lane.b32.xlu0 %v24_v2, %s42_s8  ;;  %22 = vst.msk [vmem:[#allocation0] sm:$0x3] %vm21_vm0, %v20_v3  }
  0x7e   :  { %v26_v4 = vpop.permute.xlu0 %25  }
  0x7f   :  { %28 = vst.msk [vmem:[#allocation0] sm:$0x1] %vm27_vm1, %v26_v4  }
  0x86   :  { %v34_v5 = vld [vmem:[#allocation0] sm:$0xf] }
  0x87   :  { %v37_v7 = vpack.c.b16 %v43_v6, %v34_v5 }
  0x89   :  { %v38_v8 = vpack.c.b8 %v43_v6, %v37_v7 }
  0x8b   :  { %39 = vst [vmem:[%s61_s1] sm:$0x1] %v38_v8 }

// kernel: encoder_forward.1
= control target key start
LH: loop header
LB: loop body
LE: loop exit
PB: predicated region body
PF: predicated region fallthrough
CT: control target
= control target key end

     0   :  { %v860_v1 = vmov 0   ;;  %v30_v9 = vlaneseq  ;;  %vm80_vm0 = vcmask 523264   ;;  %vm693_vm1 = vcmask 261120   ;;  %s863_s28 = smov 32   ;;  %s1163_s1 = inlined_call_operand.vmem [shape: bf16[64,192], index: 1, kind: input, shape index: {}]   ;;  %s1164_s2 = inlined_call_operand.vmem [shape: f32[1,192], index: 2, kind: input, shape index: {}]   ;;  %s1165_s0 = inlined_call_operand.vmem [shape: bf16[8,8,192], index: 0, kind: input, shape index: {}]   ;;  %s1166_s4 = inlined_call_operand.vmem [shape: f32[2,8,32], index: 4, kind: output, shape index: {1}]   ;;  %s1167_s3 = inlined_call_operand.vmem [shape: f32[8,8,32], index: 3, kind: output, shape index: {0}]  }
   0x1   :  { %v892_v0 = vld [vmem:[%s1163_s1 + $0x34] ss:$8 sps:$4 sm:$0xff]   ;;  %116 = vmatprep.mubr.bf16.mxu0 %v860_v1  ;;  %191 = vmatprep.mubr.bf16.mxu1 %v860_v1  ;;  %v899_v2 = vld [vmem:[%s1163_s1 + $0x30] ss:$8 sps:$4 sm:$0xff]   ;;  %v905_v3 = vld [vmem:[%s1163_s1 + $0x24] ss:$8 sps:$4 sm:$0xff]  }
   0x2   :  { %92 = vmatprep.subr.bf16.mxu0 %v892_v0  ;;  %167 = vmatprep.subr.bf16.mxu1 %v892_v0  ;;  %v912_v4 = vld [vmem:[%s1163_s1 + $0x20] ss:$8 sps:$4 sm:$0xff]   ;;  %v919_v5 = vld [vmem:[%s1163_s1 + $0x14] ss:$8 sps:$4 sm:$0xff]   ;;  %v926_v6 = vld [vmem:[%s1163_s1 + $0x10] ss:$8 sps:$4 sm:$0xff]  }
   0x3   :  { %93 = vmatpush1.bf16.msra.mxu0 %v899_v2  ;;  %168 = vmatpush1.bf16.msra.mxu1 %v899_v2  ;;  %v933_v7 = vld [vmem:[%s1163_s1 + $0x4] ss:$8 sps:$4 sm:$0xff]   ;;  %v940_v8 = vld [vmem:[%s1163_s1] ss:$8 sps:$4 sm:$0xff]   ;;  %v31_v10 = vshrl.u32 %v30_v9, 7  ;;  %v770_v9 = vld [vmem:[%s1165_s0 + $0x10] sm:$0xff] }
   0x4   :  { %94 = vmatprep.subr.bf16.mxu0 %v905_v3  ;;  %169 = vmatprep.subr.bf16.mxu1 %v905_v3  ;;  %v25_v12 = vld [vmem:[%s1164_s2] sm:$0x3]  ;;  %s861_s2 = smov 64   ;;  %v767_v40 = vld [vmem:[%s1165_s0 + $0x8] sm:$0xff] }
   0x5   :  { %v32_v11 = vsub.s32 0, %v31_v10  ;;  %v26_v13 = vld [vmem:[%s1165_s0] sm:$0xff]  ;;  %v36_v25 = vsub.s32 1, %v31_v10  ;;  %v150_v41 = vunpack.c.l.bf16 %v767_v40  ;;  %v151_v51 = vunpack.c.h.bf16 %v767_v40 }
   0x6   :  { %v27_v15 = vunpack.c.l.bf16 %v26_v13  ;;  %v28_v27 = vunpack.c.h.bf16 %v26_v13  ;;  %v226_v10 = vunpack.c.l.bf16 %v770_v9 }
   0x7   :  { %95 = vmatpush1.bf16.msra.mxu0 %v912_v4  ;;  %170 = vmatpush1.bf16.msra.mxu1 %v912_v4  ;;  %v965_v14 = vrot.slane %v25_v12, %v32_v11  ;;  %v968_v26 = vrot.slane %v25_v12, %v36_v25 }
   0x8   :  { %96 = vmatprep.subr.bf16.mxu0 %v919_v5  ;;  %171 = vmatprep.subr.bf16.mxu1 %v919_v5 }
   0xb   :  { %97 = vmatpush1.bf16.msra.mxu0 %v926_v6  ;;  %172 = vmatpush1.bf16.msra.mxu1 %v926_v6 }
   0xc   :  { %98 = vmatprep.subr.bf16.mxu0 %v933_v7  ;;  %173 = vmatprep.subr.bf16.mxu1 %v933_v7 }
   0xf   :  { %99 = vmatpush1.bf16.msra.mxu0 %v940_v8  ;;  %174 = vmatpush1.bf16.msra.mxu1 %v940_v8 }
  0x10   :  { %243 = vmatprep.subr.bf16.mxu0 %v892_v0  ;;  %319 = vmatprep.subr.bf16.mxu1 %v892_v0 }
  0x12   :  { %117 = vmatmul.mubr.bf16.vlgmr.msra.gmra.mxu0 %v860_v1 }
  0x13   :  { %244 = vmatpush1.bf16.msra.mxu0 %v899_v2  ;;  %267 = vmatprep.mubr.bf16.mxu0 %v860_v1 }
  0x14   :  { %245 = vmatprep.subr.bf16.mxu0 %v905_v3 }
  0x17   :  { %246 = vmatpush1.bf16.msra.mxu0 %v912_v4 }
  0x18   :  { %247 = vmatprep.subr.bf16.mxu0 %v919_v5 }
  0x1b   :  { %248 = vmatpush1.bf16.msra.mxu0 %v926_v6 }
  0x1c   :  { %249 = vmatprep.subr.bf16.mxu0 %v933_v7 }
  0x1f   :  { %250 = vmatpush1.bf16.msra.mxu0 %v940_v8 }
  0x20   :  { %395 = vmatprep.subr.bf16.mxu0 %v892_v0 }
  0xd2   :  { %v118_v16 = vpop.f32.mrf.mxu0 }
  0xd3   :  { %v119_v17 = vadd.f32 %v118_v16, %v965_v14 }
  0xd4   :  { %v120_v18 = vpop.f32.mrf.mxu0 }
  0xd5   :  { %v125_v19 = vadd.f32 %v119_v17, %v27_v15  ;;  %v121_v28 = vadd.f32 %v120_v18, %v968_v26 }
  0xd6   :  { %v122_v20 = vpop.f32.mrf.mxu0 }
  0xd7   :  { %v766_v21 = vmul.f32 -1.442695, %v125_v19 }
  0xd8   :  { %v123_v22 = vpop.f32.mrf.mxu0 }
  0xd9   :  { %812 = vpow2.f32 %v766_v21  ;;  %v227_v21 = vunpack.c.h.bf16 %v770_v9 }
  0xe6   :  { %v813_v23 = vpop.eup %812 }
  0xe7   :  { %v129_v24 = vadd.f32 1.0, %v813_v23 }
  0xe9   :  { %814 = vrcp.f32 %v129_v24 }
  0xf6   :  { %v815_v29 = vpop.eup %814 }
  0xf7   :  { %v132_v30 = vmul.f32 %v815_v29, %v121_v28  ;;  %v135_v33 = vsub.f32 1.0, %v815_v29  ;;  %v141_v35 = vmul.f32 0.0, %v815_v29 }
  0xf9   :  { %v133_v31 = vadd.f32 %v132_v30, %v28_v27 }
  0xfb   :  { %816 = vtanh.f32 %v133_v31 }
 0x108   :  { %v817_v32 = vpop.eup %816 }
 0x109   :  { %137 = vrot.lane.b32.xlu0 %v817_v32, %s861_s2 }
 0x17b   :  { %v138_v34 = vpop.permute.xlu0 %137 }
 0x17c   :  { %v140_v36 = vmul.f32 %v138_v34, %v135_v33 }
 0x17e   :  { %v972_v37 = vadd.f32 %v141_v35, %v140_v36  ;;  %v773_v35 = vld [vmem:[%s1165_s0 + $0x18] sm:$0xff] }
 0x17f   :  { %v302_v36 = vunpack.c.l.bf16 %v773_v35 }
 0x180   :  { %v152_v38 = vpack.c.bf16 %v972_v37, %v972_v37 }
 0x182   :  { %154 = vrot.lane.b32.xlu0 %v152_v38, %s861_s2 }
 0x1f4   :  { %v155_v39 = vpop.permute.xlu0 %154 }
 0x1f5   :  { %768 = vmatmul.mubr.msk.bf16.vlgmr.msra.gmra.mxu1 %vm80_vm0, %v155_v39 }
 0x1f6   :  { %320 = vmatpush1.bf16.msra.mxu1 %v899_v2  ;;  %343 = vmatprep.mubr.bf16.mxu1 %v860_v1 }
 0x1f7   :  { %321 = vmatprep.subr.bf16.mxu1 %v905_v3 }
 0x1fa   :  { %322 = vmatpush1.bf16.msra.mxu1 %v912_v4 }
 0x1fb   :  { %323 = vmatprep.subr.bf16.mxu1 %v919_v5 }
 0x1fe   :  { %324 = vmatpush1.bf16.msra.mxu1 %v926_v6 }
 0x1ff   :  { %325 = vmatprep.subr.bf16.mxu1 %v933_v7 }
 0x202   :  { %326 = vmatpush1.bf16.msra.mxu1 %v940_v8 }
 0x203   :  { %471 = vmatprep.subr.bf16.mxu1 %v892_v0 }
 0x2b5   :  { %v193_v42 = vpop.f32.mrf.mxu1 }
 0x2b6   :  { %v194_v43 = vadd.f32 %v193_v42, %v965_v14 }
 0x2b7   :  { %v195_v44 = vpop.f32.mrf.mxu1 }
 0x2b8   :  { %v200_v45 = vadd.f32 %v194_v43, %v150_v41  ;;  %v196_v52 = vadd.f32 %v195_v44, %v968_v26 }
 0x2b9   :  { %v197_v46 = vpop.f32.mrf.mxu1 }
 0x2ba   :  { %v769_v47 = vmul.f32 -1.442695, %v200_v45 }
 0x2bb   :  { %v198_v48 = vpop.f32.mrf.mxu1 }
 0x2bc   :  { %818 = vpow2.f32 %v769_v47  ;;  %v303_v47 = vunpack.c.h.bf16 %v773_v35 }
 0x2c9   :  { %v819_v49 = vpop.eup %818 }
 0x2ca   :  { %v204_v50 = vadd.f32 1.0, %v819_v49 }
 0x2cc   :  { %820 = vrcp.f32 %v204_v50 }
 0x2d9   :  { %v821_v53 = vpop.eup %820 }
 0x2da   :  { %v207_v54 = vmul.f32 %v821_v53, %v196_v52  ;;  %v210_v57 = vsub.f32 1.0, %v821_v53  ;;  %v216_v59 = vmul.f32 %v821_v53, %v972_v37 }
 0x2dc   :  { %v208_v55 = vadd.f32 %v207_v54, %v151_v51 }
 0x2de   :  { %822 = vtanh.f32 %v208_v55 }
 0x2eb   :  { %v823_v56 = vpop.eup %822 }
 0x2ec   :  { %212 = vrot.lane.b32.xlu1 %v823_v56, %s861_s2 }
 0x35e   :  { %v213_v58 = vpop.permute.xlu1 %212 }
 0x35f   :  { %v215_v60 = vmul.f32 %v213_v58, %v210_v57 }
 0x361   :  { %v994_v61 = vadd.f32 %v216_v59, %v215_v60  ;;  %v776_v59 = vld [vmem:[%s1165_s0 + $0x20] sm:$0xff] }
 0x362   :  { %v378_v60 = vunpack.c.l.bf16 %v776_v59 }
 0x363   :  { %v228_v62 = vpack.c.bf16 %v994_v61, %v994_v61 }
 0x365   :  { %230 = vrot.lane.b32.xlu1 %v228_v62, %s861_s2 }
 0x3d7   :  { %v231_v63 = vpop.permute.xlu1 %230 }
 0x3d8   :  { %771 = vmatmul.mubr.msk.bf16.vlgmr.msra.gmra.mxu0 %vm80_vm0, %v231_v63 }
 0x3d9   :  { %396 = vmatpush1.bf16.msra.mxu0 %v899_v2  ;;  %419 = vmatprep.mubr.bf16.mxu0 %v860_v1 }
 0x3da   :  { %397 = vmatprep.subr.bf16.mxu0 %v905_v3 }
 0x3dd   :  { %398 = vmatpush1.bf16.msra.mxu0 %v912_v4 }
 0x3de   :  { %399 = vmatprep.subr.bf16.mxu0 %v919_v5 }
 0x3e1   :  { %400 = vmatpush1.bf16.msra.mxu0 %v926_v6 }
 0x3e2   :  { %401 = vmatprep.subr.bf16.mxu0 %v933_v7 }
 0x3e5   :  { %402 = vmatpush1.bf16.msra.mxu0 %v940_v8 }
 0x3e6   :  { %547 = vmatprep.subr.bf16.mxu0 %v892_v0 }
 0x498   :  { %v269_v11 = vpop.f32.mrf.mxu0 }
 0x499   :  { %v270_v12 = vadd.f32 %v269_v11, %v965_v14 }
 0x49a   :  { %v271_v13 = vpop.f32.mrf.mxu0 }
 0x49b   :  { %v276_v15 = vadd.f32 %v270_v12, %v226_v10  ;;  %v272_v22 = vadd.f32 %v271_v13, %v968_v26 }
 0x49c   :  { %v273_v16 = vpop.f32.mrf.mxu0 }
 0x49d   :  { %v772_v17 = vmul.f32 -1.442695, %v276_v15 }
 0x49e   :  { %v274_v18 = vpop.f32.mrf.mxu0 }
 0x49f   :  { %824 = vpow2.f32 %v772_v17  ;;  %v379_v17 = vunpack.c.h.bf16 %v776_v59 }
 0x4ac   :  { %v825_v19 = vpop.eup %824 }
 0x4ad   :  { %v280_v20 = vadd.f32 1.0, %v825_v19 }
 0x4af   :  { %826 = vrcp.f32 %v280_v20 }
 0x4bc   :  { %v827_v23 = vpop.eup %826 }
 0x4bd   :  { %v283_v24 = vmul.f32 %v827_v23, %v272_v22  ;;  %v286_v28 = vsub.f32 1.0, %v827_v23  ;;  %v292_v30 = vmul.f32 %v827_v23, %v994_v61 }
 0x4bf   :  { %v284_v25 = vadd.f32 %v283_v24, %v227_v21 }
 0x4c1   :  { %828 = vtanh.f32 %v284_v25 }
 0x4ce   :  { %v829_v27 = vpop.eup %828 }
 0x4cf   :  { %288 = vrot.lane.b32.xlu0 %v829_v27, %s861_s2 }
 0x541   :  { %v289_v29 = vpop.permute.xlu0 %288 }
 0x542   :  { %v291_v31 = vmul.f32 %v289_v29, %v286_v28 }
 0x544   :  { %v1016_v32 = vadd.f32 %v292_v30, %v291_v31  ;;  %v779_v31 = vld [vmem:[%s1165_s0 + $0x28] sm:$0xff] }
 0x546   :  { %v304_v33 = vpack.c.bf16 %v1016_v32, %v1016_v32 }
 0x548   :  { %306 = vrot.lane.b32.xlu1 %v304_v33, %s861_s2  ;;  %v454_v33 = vunpack.c.l.bf16 %v779_v31 }
 0x5ba   :  { %v307_v34 = vpop.permute.xlu1 %306 }
 0x5bb   :  { %774 = vmatmul.mubr.msk.bf16.vlgmr.msra.gmra.mxu1 %vm80_vm0, %v307_v34 }
 0x5bc   :  { %472 = vmatpush1.bf16.msra.mxu1 %v899_v2  ;;  %495 = vmatprep.mubr.bf16.mxu1 %v860_v1 }
 0x5bd   :  { %473 = vmatprep.subr.bf16.mxu1 %v905_v3 }
 0x5c0   :  { %474 = vmatpush1.bf16.msra.mxu1 %v912_v4 }
 0x5c1   :  { %475 = vmatprep.subr.bf16.mxu1 %v919_v5 }
 0x5c4   :  { %476 = vmatpush1.bf16.msra.mxu1 %v926_v6 }
 0x5c5   :  { %477 = vmatprep.subr.bf16.mxu1 %v933_v7 }
 0x5c8   :  { %478 = vmatpush1.bf16.msra.mxu1 %v940_v8 }
 0x5c9   :  { %623 = vmatprep.subr.bf16.mxu1 %v892_v0 }
 0x67b   :  { %v345_v38 = vpop.f32.mrf.mxu1 }
 0x67c   :  { %v346_v39 = vadd.f32 %v345_v38, %v965_v14 }
 0x67d   :  { %v347_v40 = vpop.f32.mrf.mxu1 }
 0x67e   :  { %v352_v41 = vadd.f32 %v346_v39, %v302_v36  ;;  %v348_v0 = vadd.f32 %v347_v40, %v968_v26 }
 0x67f   :  { %v349_v42 = vpop.f32.mrf.mxu1 }
 0x680   :  { %v775_v43 = vmul.f32 -1.442695, %v352_v41 }
 0x681   :  { %v350_v44 = vpop.f32.mrf.mxu1 }
 0x682   :  { %830 = vpow2.f32 %v775_v43 }
 0x68f   :  { %v831_v45 = vpop.eup %830 }
 0x690   :  { %v356_v46 = vadd.f32 1.0, %v831_v45 }
 0x692   :  { %832 = vrcp.f32 %v356_v46 }
 0x69f   :  { %v833_v48 = vpop.eup %832 }
 0x6a0   :  { %v359_v49 = vmul.f32 %v833_v48, %v348_v0  ;;  %v362_v52 = vsub.f32 1.0, %v833_v48  ;;  %v368_v54 = vmul.f32 %v833_v48, %v1016_v32  ;;  %v782_v48 = vld [vmem:[%s1165_s0 + $0x30] sm:$0xff] }
 0x6a2   :  { %v360_v50 = vadd.f32 %v359_v49, %v303_v47  ;;  %v530_v49 = vunpack.c.l.bf16 %v782_v48 }
 0x6a4   :  { %834 = vtanh.f32 %v360_v50 }
 0x6b1   :  { %v835_v51 = vpop.eup %834 }
 0x6b2   :  { %364 = vrot.lane.b32.xlu0 %v835_v51, %s861_s2 }
 0x724   :  { %v365_v53 = vpop.permute.xlu0 %364 }
 0x725   :  { %v367_v55 = vmul.f32 %v365_v53, %v362_v52 }
 0x727   :  { %v1038_v56 = vadd.f32 %v368_v54, %v367_v55 }
 0x729   :  { %v380_v57 = vpack.c.bf16 %v1038_v56, %v1038_v56 }
 0x72b   :  { %382 = vrot.lane.b32.xlu1 %v380_v57, %s861_s2 }
 0x79d   :  { %v383_v58 = vpop.permute.xlu1 %382 }
 0x79e   :  { %777 = vmatmul.mubr.msk.bf16.vlgmr.msra.gmra.mxu0 %vm80_vm0, %v383_v58 }
 0x79f   :  { %548 = vmatpush1.bf16.msra.mxu0 %v899_v2  ;;  %571 = vmatprep.mubr.bf16.mxu0 %v860_v1 }
 0x7a0   :  { %549 = vmatprep.subr.bf16.mxu0 %v905_v3 }
 0x7a3   :  { %550 = vmatpush1.bf16.msra.mxu0 %v912_v4 }
 0x7a4   :  { %551 = vmatprep.subr.bf16.mxu0 %v919_v5 }
 0x7a7   :  { %552 = vmatpush1.bf16.msra.mxu0 %v926_v6 }
 0x7a8   :  { %553 = vmatprep.subr.bf16.mxu0 %v933_v7 }
 0x7ab   :  { %554 = vmatpush1.bf16.msra.mxu0 %v940_v8 }
 0x85e   :  { %v421_v62 = vpop.f32.mrf.mxu0 }
 0x85f   :  { %v422_v63 = vadd.f32 %v421_v62, %v965_v14 }
 0x860   :  { %v423_v9 = vpop.f32.mrf.mxu0 }
 0x861   :  { %v428_v10 = vadd.f32 %v422_v63, %v378_v60  ;;  %v424_v18 = vadd.f32 %v423_v9, %v968_v26  ;;  %v531_v60 = vunpack.c.h.bf16 %v782_v48 }
 0x862   :  { %v425_v11 = vpop.f32.mrf.mxu0 }
 0x863   :  { %v778_v12 = vmul.f32 -1.442695, %v428_v10 }
 0x864   :  { %v426_v13 = vpop.f32.mrf.mxu0 }
 0x865   :  { %836 = vpow2.f32 %v778_v12 }
 0x872   :  { %v837_v15 = vpop.eup %836 }
 0x873   :  { %v432_v16 = vadd.f32 1.0, %v837_v15 }
 0x875   :  { %838 = vrcp.f32 %v432_v16 }
 0x882   :  { %v839_v19 = vpop.eup %838 }
 0x883   :  { %v435_v20 = vmul.f32 %v839_v19, %v424_v18  ;;  %v438_v23 = vsub.f32 1.0, %v839_v19  ;;  %v444_v25 = vmul.f32 %v839_v19, %v1038_v56 }
 0x885   :  { %v436_v21 = vadd.f32 %v435_v20, %v379_v17 }
 0x887   :  { %840 = vtanh.f32 %v436_v21 }
 0x894   :  { %v841_v22 = vpop.eup %840 }
 0x895   :  { %440 = vrot.lane.b32.xlu0 %v841_v22, %s861_s2 }
 0x907   :  { %v441_v24 = vpop.permute.xlu0 %440 }
 0x908   :  { %v443_v27 = vmul.f32 %v441_v24, %v438_v23 }
 0x90a   :  { %v1059_v28 = vadd.f32 %v444_v25, %v443_v27 }
 0x90c   :  { %v456_v29 = vpack.c.bf16 %v1059_v28, %v1059_v28 }
 0x90e   :  { %458 = vrot.lane.b32.xlu1 %v456_v29, %s861_s2 }
 0x980   :  { %v459_v30 = vpop.permute.xlu1 %458 }
 0x981   :  { %780 = vmatmul.mubr.msk.bf16.vlgmr.msra.gmra.mxu1 %vm80_vm0, %v459_v30 }
 0x982   :  { %624 = vmatpush1.bf16.msra.mxu1 %v899_v2  ;;  %647 = vmatprep.mubr.bf16.mxu1 %v860_v1 }
 0x983   :  { %625 = vmatprep.subr.bf16.mxu1 %v905_v3 }
 0x986   :  { %626 = vmatpush1.bf16.msra.mxu1 %v912_v4 }
 0x987   :  { %627 = vmatprep.subr.bf16.mxu1 %v919_v5 }
 0x98a   :  { %628 = vmatpush1.bf16.msra.mxu1 %v926_v6 }
 0x98b   :  { %629 = vmatprep.subr.bf16.mxu1 %v933_v7  ;;  %v455_v7 = vunpack.c.h.bf16 %v779_v31 }
 0x98e   :  { %630 = vmatpush1.bf16.msra.mxu1 %v940_v8 }
 0xa41   :  { %v497_v2 = vpop.f32.mrf.mxu1 }
 0xa42   :  { %v498_v1 = vadd.f32 %v497_v2, %v965_v14 }
 0xa43   :  { %v499_v34 = vpop.f32.mrf.mxu1 }
 0xa44   :  { %v504_v3 = vadd.f32 %v498_v1, %v454_v33  ;;  %v500_v8 = vadd.f32 %v499_v34, %v968_v26 }
 0xa45   :  { %v501_v35 = vpop.f32.mrf.mxu1 }
 0xa46   :  { %v781_v4 = vmul.f32 -1.442695, %v504_v3 }
 0xa47   :  { %v502_v36 = vpop.f32.mrf.mxu1 }
 0xa48   :  { %842 = vpow2.f32 %v781_v4 }
 0xa55   :  { %v843_v5 = vpop.eup %842 }
 0xa56   :  { %v508_v6 = vadd.f32 1.0, %v843_v5 }
 0xa58   :  { %844 = vrcp.f32 %v508_v6 }
 0xa65   :  { %v845_v38 = vpop.eup %844 }
 0xa66   :  { %v511_v39 = vmul.f32 %v845_v38, %v500_v8  ;;  %v514_v42 = vsub.f32 1.0, %v845_v38  ;;  %v520_v44 = vmul.f32 %v845_v38, %v1059_v28 }
 0xa68   :  { %v512_v40 = vadd.f32 %v511_v39, %v455_v7 }
 0xa6a   :  { %846 = vtanh.f32 %v512_v40 }
 0xa77   :  { %v847_v41 = vpop.eup %846 }
 0xa78   :  { %516 = vrot.lane.b32.xlu0 %v847_v41, %s861_s2 }
 0xaea   :  { %v517_v43 = vpop.permute.xlu0 %516 }
 0xaeb   :  { %v519_v45 = vmul.f32 %v517_v43, %v514_v42 }
 0xaed   :  { %v1080_v46 = vadd.f32 %v520_v44, %v519_v45 }
 0xaef   :  { %v532_v47 = vpack.c.bf16 %v1080_v46, %v1080_v46 }
 0xaf1   :  { %534 = vrot.lane.b32.xlu1 %v532_v47, %s861_s2 }
 0xb63   :  { %v535_v0 = vpop.permute.xlu1 %534 }
 0xb64   :  { %783 = vmatmul.mubr.msk.bf16.vlgmr.msra.gmra.mxu0 %vm80_vm0, %v535_v0 }
 0xc24   :  { %v573_v50 = vpop.f32.mrf.mxu0 }
 0xc25   :  { %v574_v51 = vadd.f32 %v573_v50, %v965_v14 }
 0xc26   :  { %v575_v52 = vpop.f32.mrf.mxu0 }
 0xc27   :  { %v580_v53 = vadd.f32 %v574_v51, %v530_v49  ;;  %v576_v62 = vadd.f32 %v575_v52, %v968_v26 }
 0xc28   :  { %v577_v54 = vpop.f32.mrf.mxu0 }
 0xc29   :  { %v784_v55 = vmul.f32 -1.442695, %v580_v53 }
 0xc2a   :  { %v578_v57 = vpop.f32.mrf.mxu0 }
 0xc2b   :  { %848 = vpow2.f32 %v784_v55 }
 0xc38   :  { %v849_v58 = vpop.eup %848 }
 0xc39   :  { %v584_v59 = vadd.f32 1.0, %v849_v58 }
 0xc3b   :  { %850 = vrcp.f32 %v584_v59 }
 0xc48   :  { %v851_v63 = vpop.eup %850 }
 0xc49   :  { %v587_v9 = vmul.f32 %v851_v63, %v576_v62  ;;  %v590_v12 = vsub.f32 1.0, %v851_v63  ;;  %v596_v15 = vmul.f32 %v851_v63, %v1080_v46 }
 0xc4b   :  { %v588_v10 = vadd.f32 %v587_v9, %v531_v60 }
 0xc4d   :  { %852 = vtanh.f32 %v588_v10 }
 0xc5a   :  { %v853_v11 = vpop.eup %852 }
 0xc5b   :  { %592 = vrot.lane.b32.xlu0 %v853_v11, %s861_s2 }
 0xccd   :  { %v593_v13 = vpop.permute.xlu0 %592 }
 0xcce   :  { %v595_v16 = vmul.f32 %v593_v13, %v590_v12 }
 0xcd0   :  { %v597_v17 = vadd.f32 %v596_v15, %v595_v16 }
 0xcd2   :  { %v608_v18 = vpack.c.bf16 %v597_v17, %v597_v17 }
 0xcd4   :  { %610 = vrot.lane.b32.xlu1 %v608_v18, %s861_s2 }
 0xcd8   :  { %144 = vrot.lane.b32.xlu1 %v972_v37, %s861_s2 }
 0xcdc   :  { %295 = vrot.lane.b32.xlu1 %v1016_v32, %s861_s2  ;;  %v785_v32 = vld [vmem:[%s1165_s0 + $0x38] sm:$0xff]  ;;  %s862_s0 = smov 96  }
 0xcdd   :  { %v606_v23 = vunpack.c.l.bf16 %v785_v32  ;;  %v607_v1 = vunpack.c.h.bf16 %v785_v32 }
 0xce0   :  { %447 = vrot.lane.b32.xlu1 %v1059_v28, %s861_s2 }
 0xce4   :  { %599 = vrot.lane.b32.xlu1 %v597_v17, %s861_s2 }
 0xd46   :  { %v611_v19 = vpop.permute.xlu1 %610 }
 0xd47   :  { %786 = vmatmul.mubr.msk.bf16.vlgmr.msra.gmra.mxu1 %vm80_vm0, %v611_v19 }
 0xd4a   :  { %v145_v20 = vpop.permute.xlu1 %144 }
 0xd4b   :  { %147 = vst.msk [vmem:[#allocation2] sm:$0xff] %vm80_vm0, %v145_v20 }
 0xd4e   :  { %v296_v21 = vpop.permute.xlu1 %295 }
 0xd4f   :  { %299 = vst.msk [vmem:[#allocation2 + $0x10] sm:$0xff] %vm80_vm0, %v296_v21 }
 0xd52   :  { %v448_v22 = vpop.permute.xlu1 %447  ;;  %v680_v42 = vld [vmem:[#allocation2] sm:$0xff] }
 0xd53   :  { %451 = vst.msk [vmem:[#allocation2 + $0x20] sm:$0xff] %vm80_vm0, %v448_v22 }
 0xd56   :  { %v600_v37 = vpop.permute.xlu1 %599  ;;  %v682_v40 = vld [vmem:[#allocation2 + $0x10] sm:$0xff] }
 0xd57   :  { %603 = vst.msk [vmem:[#allocation2 + $0x30] sm:$0xff] %vm80_vm0, %v600_v37 }
 0xd5e   :  { %v686_v39 = vld [vmem:[#allocation2 + $0x30] sm:$0xff] }
 0xe07   :  { %v649_v24 = vpop.f32.mrf.mxu1 }
 0xe08   :  { %v650_v25 = vadd.f32 %v649_v24, %v965_v14 }
 0xe09   :  { %v651_v27 = vpop.f32.mrf.mxu1 }
 0xe0a   :  { %v656_v28 = vadd.f32 %v650_v25, %v606_v23  ;;  %v652_v34 = vadd.f32 %v651_v27, %v968_v26 }
 0xe0b   :  { %v653_v29 = vpop.f32.mrf.mxu1 }
 0xe0c   :  { %v787_v30 = vmul.f32 -1.442695, %v656_v28 }
 0xe0d   :  { %v654_v31 = vpop.f32.mrf.mxu1 }
 0xe0e   :  { %854 = vpow2.f32 %v787_v30 }
 0xe1b   :  { %v855_v33 = vpop.eup %854 }
 0xe1c   :  { %v660_v2 = vadd.f32 1.0, %v855_v33 }
 0xe1e   :  { %856 = vrcp.f32 %v660_v2 }
 0xe2b   :  { %v857_v3 = vpop.eup %856 }
 0xe2c   :  { %v663_v35 = vmul.f32 %v857_v3, %v652_v34  ;;  %v666_v14 = vsub.f32 1.0, %v857_v3  ;;  %v672_v6 = vmul.f32 %v857_v3, %v597_v17 }
 0xe2e   :  { %v664_v4 = vadd.f32 %v663_v35, %v607_v1 }
 0xe30   :  { %858 = vtanh.f32 %v664_v4 }
 0xe3d   :  { %v859_v36 = vpop.eup %858 }
 0xe3e   :  { %668 = vrot.lane.b32.xlu0 %v859_v36, %s861_s2 }
 0xe42   :  { %219 = vrot.lane.b32.xlu0 %v994_v61, %s861_s2 }
 0xe46   :  { %371 = vrot.lane.b32.xlu0 %v1038_v56, %s861_s2  ;;  %v684_v56 = vld [vmem:[#allocation2 + $0x20] sm:$0xff] }
 0xe4a   :  { %523 = vrot.lane.b32.xlu0 %v1080_v46, %s861_s2 }
 0xeb0   :  { %v669_v5 = vpop.permute.xlu0 %668 }
 0xeb1   :  { %v671_v26 = vmul.f32 %v669_v5, %v666_v14 }
 0xeb3   :  { %v673_v7 = vadd.f32 %v672_v6, %v671_v26 }
 0xeb4   :  { %v220_v8 = vpop.permute.xlu0 %219 }
 0xeb5   :  { %223 = vst.msk [vmem:[#allocation2 + $0x8] sm:$0xff] %vm80_vm0, %v220_v8  ;;  %675 = vrot.lane.b32.xlu0 %v673_v7, %s861_s2 }
 0xeb8   :  { %v372_v38 = vpop.permute.xlu0 %371 }
 0xeb9   :  { %375 = vst.msk [vmem:[#allocation2 + $0x18] sm:$0xff] %vm80_vm0, %v372_v38  ;;  %696 = vrot.lane.b32.xlu0 %v686_v39, %s862_s0 }
 0xebc   :  { %v524_v61 = vpop.permute.xlu0 %523  ;;  %v681_v44 = vld [vmem:[#allocation2 + $0x8] sm:$0xff] }
 0xebd   :  { %527 = vst.msk [vmem:[#allocation2 + $0x28] sm:$0xff] %vm80_vm0, %v524_v61  ;;  %710 = vrot.lane.b32.xlu0 %v684_v56, %s862_s0 }
 0xec0   :  { %v683_v43 = vld [vmem:[#allocation2 + $0x18] sm:$0xff] }
 0xec1   :  { %724 = vrot.lane.b32.xlu0 %v682_v40, %s862_s0 }
 0xec4   :  { %v685_v41 = vld [vmem:[#allocation2 + $0x28] sm:$0xff] }
 0xec5   :  { %703 = vrot.lane.b32.xlu1 %v685_v41, %s862_s0  ;;  %738 = vrot.lane.b32.xlu0 %v680_v42, %s862_s0 }
 0xec9   :  { %717 = vrot.lane.b32.xlu1 %v683_v43, %s862_s0 }
 0xecd   :  { %731 = vrot.lane.b32.xlu1 %v681_v44, %s862_s0 }
 0xf27   :  { %v676_v45 = vpop.permute.xlu0 %675 }
 0xf28   :  { %679 = vst.msk [vmem:[#allocation2 + $0x38] sm:$0xff] %vm80_vm0, %v676_v45 }
 0xf29   :  { %744 = vst.msk [vmem:[%s1166_s4] sm:$0xff] %vm693_vm1, %v676_v45 }
 0xf2b   :  { %v697_v46 = vpop.permute.xlu0 %696 }
 0xf2c   :  { %v699_v47 = vadd.f32 %v697_v46, %v681_v44 }
 0xf2e   :  { %788 = vst.msk [vmem:[%s1167_s3 + $0x8] sm:$0xff] %vm693_vm1, %v699_v47 }
 0xf2f   :  { %v711_v0 = vpop.permute.xlu0 %710  ;;  %v687_v48 = vld [vmem:[#allocation2 + $0x38] sm:$0xff] }
 0xf30   :  { %v713_v49 = vadd.f32 %v711_v0, %v683_v43  ;;  %689 = vrot.lane.b32.xlu1 %v687_v48, %s862_s0 }
 0xf32   :  { %790 = vst.msk [vmem:[%s1167_s3 + $0x18] sm:$0xff] %vm693_vm1, %v713_v49 }
 0xf33   :  { %v725_v50 = vpop.permute.xlu0 %724 }
 0xf34   :  { %v727_v51 = vadd.f32 %v725_v50, %v685_v41  ;;  %745 = vrot.lane.b32.xlu1 %v673_v7, %s863_s28 }
 0xf36   :  { %792 = vst.msk [vmem:[%s1167_s3 + $0x28] sm:$0xff] %vm693_vm1, %v727_v51 }
 0xf37   :  { %v739_v52 = vpop.permute.xlu0 %738  ;;  %v704_v53 = vpop.permute.xlu1 %703 }
 0xf38   :  { %v741_v54 = vadd.f32 %v739_v52, %v687_v48  ;;  %v706_v55 = vadd.f32 %v704_v53, %v682_v40 }
 0xf3a   :  { %794 = vst.msk [vmem:[%s1167_s3 + $0x38] sm:$0xff] %vm693_vm1, %v741_v54  ;;  %789 = vst.msk [vmem:[%s1167_s3 + $0x10] sm:$0xff] %vm693_vm1, %v706_v55 }
 0xf3b   :  { %v718_v57 = vpop.permute.xlu1 %717 }
 0xf3c   :  { %v720_v58 = vadd.f32 %v718_v57, %v684_v56 }
 0xf3e   :  { %791 = vst.msk [vmem:[%s1167_s3 + $0x20] sm:$0xff] %vm693_vm1, %v720_v58 }
 0xf3f   :  { %v732_v59 = vpop.permute.xlu1 %731 }
 0xf40   :  { %v734_v60 = vadd.f32 %v732_v59, %v686_v39 }
 0xf42   :  { %793 = vst.msk [vmem:[%s1167_s3 + $0x30] sm:$0xff] %vm693_vm1, %v734_v60 }
 0xfa2   :  { %v690_v62 = vpop.permute.xlu1 %689 }
 0xfa3   :  { %v692_v63 = vadd.f32 %v690_v62, %v680_v42 }
 0xfa5   :  { %694 = vst.msk [vmem:[%s1167_s3] sm:$0xff] %vm693_vm1, %v692_v63 }
 0xfa6   :  { %v746_v9 = vpop.permute.xlu1 %745 }
 0xfa7   :  { %795 = vst.msk [vmem:[%s1166_s4 + $0x8] sm:$0xff] %vm693_vm1, %v746_v9 }

</bundles_post_ra>
